<compile_context>
chip_gen: v6e
topology: v6e:2x2x1
jax: 0.10.0
libtpu: 0.0.40
codegen_flags: <defaults>
</compile_context>

<pallas_src>
import functools

import jax
import jax.numpy as jnp
from jax.experimental import pallas as pl
from jax.experimental.pallas import tpu as pltpu

IN_FEATURES = 28 * 28     # 784 — used as a full-dim block (no lane padding)
HIDDEN = 512
OUT_FEATURES = 10
OUT_PAD = 128             # lane-dense output width


def _round_up(x, m):
    return ((x + m - 1) // m) * m


def _mlp_kernel(x_ref, w1_ref, b1_ref, w2_ref, b2_ref, w3_ref, b3_ref, o_ref):
    # MXU inputs follow the weight dtype (bf16 default, f32 optional);
    # accumulation, bias add and ReLU are always f32.
    cdt = w1_ref.dtype
    x = x_ref[...].astype(cdt)
    # Layer 1: (TB, 784) @ (784, 512) + (1, 512), ReLU
    h1 = jnp.dot(x, w1_ref[...], preferred_element_type=jnp.float32)
    h1 = jnp.maximum(h1 + b1_ref[...], 0.0)
    # Layer 2: (TB, 512) @ (512, 512) + (1, 512), ReLU
    h2 = jnp.dot(h1.astype(cdt), w2_ref[...], preferred_element_type=jnp.float32)
    h2 = jnp.maximum(h2 + b2_ref[...], 0.0)
    # Layer 3: (TB, 512) @ (512, 128 lane-padded) + (1, 128)
    out = jnp.dot(h2.astype(cdt), w3_ref[...], preferred_element_type=jnp.float32)
    o_ref[...] = (out + b3_ref[...]).astype(o_ref.dtype)


def prepare_params(params, weights_dtype=jnp.bfloat16):
    """One-time layout prep (do this outside the per-step forward).

    Casts weights to `weights_dtype` (bf16 default — the perf path; pass
    jnp.float32 for accuracy checks), pads the last layer 10 -> 128 lanes,
    keeps biases in f32. No K-padding of w1 (784 is used as a full-dim block).
    """
    w1 = params["w1"].astype(weights_dtype)
    w2 = params["w2"].astype(weights_dtype)
    w3 = jnp.pad(params["w3"],
                 ((0, 0), (0, OUT_PAD - OUT_FEATURES))).astype(weights_dtype)
    b1 = params["b1"].astype(jnp.float32).reshape(1, HIDDEN)
    b2 = params["b2"].astype(jnp.float32).reshape(1, HIDDEN)
    b3 = jnp.pad(params["b3"].astype(jnp.float32),
                 (0, OUT_PAD - OUT_FEATURES)).reshape(1, OUT_PAD)
    # TODO(synk): for small-batch v7x serving (weight-DMA-bound), optionally
    # quantize w2/w3 to fp8 with per-output-channel scales applied after the
    # f32 accumulate.
    return {"w1": w1, "b1": b1, "w2": w2, "b2": b2, "w3": w3, "b3": b3}


@functools.partial(jax.jit, static_argnames=("tile_b",))
def fully_connected_nn(x, prepared, tile_b=512):
    """Forward pass of FullyConnectedNN.

    x: (B, 1, 28, 28) NCHW (like the PyTorch module) or flat (B, 784).
    prepared: output of prepare_params(params[, weights_dtype]).
    tile_b: desired batch tile (default 512; fine on v5e/v6e/v7x — do not
        shrink below 256 on v5e). Rounded to a multiple of 8 and capped so
        large batches keep >= 2 grid steps (v7x megacore sharding).
    Returns: (B, 10) float32 logits.
    """
    B = x.shape[0]
    wdt = prepared["w1"].dtype
    # x travels HBM->VMEM in the weight dtype (bf16 default) to halve input
    # DMA bytes; the kernel accumulates in f32 regardless.
    x_flat = x.reshape(B, -1).astype(wdt)
    assert x_flat.shape[1] == IN_FEATURES

    # Batch tile: multiple of 8 sublanes, never larger than the padded batch,
    # and capped so batches >= 512 rows produce >= 2 grid steps.
    b8 = max(8, _round_up(B, 8))
    tb = max(8, _round_up(min(int(tile_b), b8), 8))
    if b8 >= 512:
        tb = min(tb, _round_up((b8 + 1) // 2, 8))
    Bp = _round_up(B, tb)

    if Bp != B:
        x_flat = jnp.pad(x_flat, ((0, Bp - B), (0, 0)))

    w1, b1 = prepared["w1"], prepared["b1"]
    w2, b2 = prepared["w2"], prepared["b2"]
    w3, b3 = prepared["w3"], prepared["b3"]

    weight_bytes = sum(a.size * a.dtype.itemsize
                       for a in (w1, b1, w2, b2, w3, b3))
    cost = pl.CostEstimate(
        flops=2 * Bp * (IN_FEATURES * HIDDEN + HIDDEN * HIDDEN + HIDDEN * OUT_PAD),
        transcendentals=0,
        bytes_accessed=int(weight_bytes
                           + x_flat.size * x_flat.dtype.itemsize
                           + Bp * OUT_PAD * 4),
    )

    # Peak VMEM at tb=1024 bf16 is ~14 MiB (x double-buffer + resident weights
    # + f32 h1/h2 temporaries); scale the cap with the tile so Mosaic never
    # re-tiles or fails the scoped-VMEM check (v5e's default is only 16 MiB).
    vmem_limit = (32 << 20) if tb >= 512 else (16 << 20)

    # TODO(synk): for grid=1 online inference (B<=32), hide the one-time
    # weight HBM->VMEM fetch with a cross-call prefetch (P10 pattern) instead
    # of paying it inside this kernel.
    out = pl.pallas_call(
        _mlp_kernel,
        out_shape=jax.ShapeDtypeStruct((Bp, OUT_PAD), jnp.float32),
        grid=(Bp // tb,),
        in_specs=[
            pl.BlockSpec((tb, IN_FEATURES), lambda i: (i, 0)),       # x (batch-tiled)
            pl.BlockSpec((IN_FEATURES, HIDDEN), lambda i: (0, 0)),   # w1 (resident)
            pl.BlockSpec((1, HIDDEN), lambda i: (0, 0)),             # b1
            pl.BlockSpec((HIDDEN, HIDDEN), lambda i: (0, 0)),        # w2 (resident)
            pl.BlockSpec((1, HIDDEN), lambda i: (0, 0)),             # b2
            pl.BlockSpec((HIDDEN, OUT_PAD), lambda i: (0, 0)),       # w3 (lane-padded)
            pl.BlockSpec((1, OUT_PAD), lambda i: (0, 0)),            # b3
        ],
        out_specs=pl.BlockSpec((tb, OUT_PAD), lambda i: (i, 0)),
        compiler_params=pltpu.CompilerParams(
            dimension_semantics=("parallel",),   # shard batch over v7x's 2 TCs
            vmem_limit_bytes=vmem_limit,
        ),
        cost_estimate=cost,
    )(x_flat, w1, b1, w2, b2, w3, b3)

    return out[:B, :OUT_FEATURES]


def init_params(key):
    """Deterministic init matching nn.Linear default (U(-1/sqrt(fan_in), +))."""
    dims = [(IN_FEATURES, HIDDEN), (HIDDEN, HIDDEN), (HIDDEN, OUT_FEATURES)]
    params = {}
    for i, (fan_in, fan_out) in enumerate(dims, start=1):
        key, kw, kb = jax.random.split(key, 3)
        bound = 1.0 / (fan_in ** 0.5)
        # Stored as (in, out) so the kernel computes x @ W (== torch x @ W.T).
        params[f"w{i}"] = jax.random.uniform(
            kw, (fan_in, fan_out), jnp.float32, minval=-bound, maxval=bound)
        params[f"b{i}"] = jax.random.uniform(
            kb, (fan_out,), jnp.float32, minval=-bound, maxval=bound)
    return params


def _reference_forward(x, params):
    # Pure-JAX f32 reference.
    h = x.reshape(x.shape[0], -1).astype(jnp.float32)
    h = jnp.maximum(h @ params["w1"] + params["b1"], 0.0)
    h = jnp.maximum(h @ params["w2"] + params["b2"], 0.0)
    return h @ params["w3"] + params["b3"]


if __name__ == "__main__":
    key = jax.random.PRNGKey(0)
    kparam, kx = jax.random.split(key)

    params = init_params(kparam)
    # MNIST-shaped input: batch=2, NCHW (2, 1, 28, 28).
    x = jax.random.normal(kx, (2, 1, 28, 28), dtype=jnp.float32)
    ref = _reference_forward(x, params)

    # f32-weight path (accuracy check): exact-ish match vs the reference.
    logits_f32 = fully_connected_nn(x, prepare_params(params, jnp.float32))
    logits_f32 = jax.block_until_ready(logits_f32)
    assert logits_f32.shape == (2, 10), logits_f32.shape
    assert jnp.allclose(logits_f32, ref, atol=1e-4, rtol=1e-4), "f32 mismatch vs reference"

    # bf16 default perf path: bf16 weights AND bf16 x DMA (x loses mantissa
    # too), f32 accumulation; looser tolerance.
    logits_bf16 = fully_connected_nn(x, prepare_params(params))
    logits_bf16 = jax.block_until_ready(logits_bf16)
    assert logits_bf16.shape == (2, 10), logits_bf16.shape
    assert jnp.allclose(logits_bf16, ref, atol=5e-2, rtol=5e-2), "bf16 mismatch vs reference"

    print("KERNEL_OK")
</pallas_src>

<mosaic_0001>
module attributes {stable_mosaic.version = 11 : i64} {
  func.func @_mlp_kernel(%arg0: i32, %arg1: memref<8x784xf32, #tpu.memory_space<vmem>>, %arg2: memref<784x512xf32, #tpu.memory_space<vmem>>, %arg3: memref<1x512xf32, #tpu.memory_space<vmem>>, %arg4: memref<512x512xf32, #tpu.memory_space<vmem>>, %arg5: memref<1x512xf32, #tpu.memory_space<vmem>>, %arg6: memref<512x128xf32, #tpu.memory_space<vmem>>, %arg7: memref<1x128xf32, #tpu.memory_space<vmem>>, %arg8: memref<8x128xf32, #tpu.memory_space<vmem>>) attributes {dimension_semantics = [#tpu.dimension_semantics<parallel>], iteration_bounds = array<i64: 1>, scalar_prefetch = 0 : i64, scratch_operands = 0 : i64, tpu.core_type = #tpu.core_type<tc>, window_params = [{transform_indices = @transform_0, window_bounds = array<i64: 8, 784>}, {pipeline_mode = #tpu.pipeline_mode<synchronous>, transform_indices = @transform_1, window_bounds = array<i64: 784, 512>}, {pipeline_mode = #tpu.pipeline_mode<synchronous>, transform_indices = @transform_2, window_bounds = array<i64: 1, 512>}, {pipeline_mode = #tpu.pipeline_mode<synchronous>, transform_indices = @transform_3, window_bounds = array<i64: 512, 512>}, {pipeline_mode = #tpu.pipeline_mode<synchronous>, transform_indices = @transform_4, window_bounds = array<i64: 1, 512>}, {pipeline_mode = #tpu.pipeline_mode<synchronous>, transform_indices = @transform_5, window_bounds = array<i64: 512, 128>}, {pipeline_mode = #tpu.pipeline_mode<synchronous>, transform_indices = @transform_6, window_bounds = array<i64: 1, 128>}, {transform_indices = @transform_7, window_bounds = array<i64: 8, 128>}]} {
    %c0 = arith.constant 0 : index
    %c0_0 = arith.constant 0 : index
    %0 = vector.load %arg1[%c0, %c0_0] : memref<8x784xf32, #tpu.memory_space<vmem>>, vector<8x784xf32>
    %c0_1 = arith.constant 0 : index
    %c0_2 = arith.constant 0 : index
    %1 = vector.load %arg2[%c0_1, %c0_2] : memref<784x512xf32, #tpu.memory_space<vmem>>, vector<784x512xf32>
    %cst = arith.constant dense<0.000000e+00> : vector<8x512xf32>
    %2 = tpu.matmul %0, %1, %cst {dimension_numbers = #tpu.dot_dimension_numbers<[1], [0], [0], [1], [0, 0, 1, 1], [], []>} : vector<8x784xf32>, vector<784x512xf32>, vector<8x512xf32> -> vector<8x512xf32>
    %c0_3 = arith.constant 0 : index
    %c0_4 = arith.constant 0 : index
    %3 = vector.load %arg3[%c0_3, %c0_4] : memref<1x512xf32, #tpu.memory_space<vmem>>, vector<1x512xf32>
    %4 = vector.broadcast %3 : vector<1x512xf32> to vector<8x512xf32>
    %5 = arith.addf %2, %4 : vector<8x512xf32>
    %cst_5 = arith.constant 0.000000e+00 : f32
    %6 = vector.broadcast %cst_5 : f32 to vector<8x512xf32>
    %7 = arith.maximumf %5, %6 : vector<8x512xf32>
    %c0_6 = arith.constant 0 : index
    %c0_7 = arith.constant 0 : index
    %8 = vector.load %arg4[%c0_6, %c0_7] : memref<512x512xf32, #tpu.memory_space<vmem>>, vector<512x512xf32>
    %cst_8 = arith.constant dense<0.000000e+00> : vector<8x512xf32>
    %9 = tpu.matmul %7, %8, %cst_8 {dimension_numbers = #tpu.dot_dimension_numbers<[1], [0], [0], [1], [0, 0, 1, 1], [], []>} : vector<8x512xf32>, vector<512x512xf32>, vector<8x512xf32> -> vector<8x512xf32>
    %c0_9 = arith.constant 0 : index
    %c0_10 = arith.constant 0 : index
    %10 = vector.load %arg5[%c0_9, %c0_10] : memref<1x512xf32, #tpu.memory_space<vmem>>, vector<1x512xf32>
    %11 = vector.broadcast %10 : vector<1x512xf32> to vector<8x512xf32>
    %12 = arith.addf %9, %11 : vector<8x512xf32>
    %cst_11 = arith.constant 0.000000e+00 : f32
    %13 = vector.broadcast %cst_11 : f32 to vector<8x512xf32>
    %14 = arith.maximumf %12, %13 : vector<8x512xf32>
    %c0_12 = arith.constant 0 : index
    %c0_13 = arith.constant 0 : index
    %15 = vector.load %arg6[%c0_12, %c0_13] : memref<512x128xf32, #tpu.memory_space<vmem>>, vector<512x128xf32>
    %cst_14 = arith.constant dense<0.000000e+00> : vector<8x128xf32>
    %16 = tpu.matmul %14, %15, %cst_14 {dimension_numbers = #tpu.dot_dimension_numbers<[1], [0], [0], [1], [0, 0, 1, 1], [], []>} : vector<8x512xf32>, vector<512x128xf32>, vector<8x128xf32> -> vector<8x128xf32>
    %c0_15 = arith.constant 0 : index
    %c0_16 = arith.constant 0 : index
    %17 = vector.load %arg7[%c0_15, %c0_16] : memref<1x128xf32, #tpu.memory_space<vmem>>, vector<1x128xf32>
    %18 = vector.broadcast %17 : vector<1x128xf32> to vector<8x128xf32>
    %19 = arith.addf %16, %18 : vector<8x128xf32>
    %c0_17 = arith.constant 0 : index
    %c0_18 = arith.constant 0 : index
    %20 = vector.load %arg8[%c0_17, %c0_18] : memref<8x128xf32, #tpu.memory_space<vmem>>, vector<8x128xf32>
    tpu.vector_store %arg8[%c0_17, %c0_18], %19 {strides = array<i32>} : memref<8x128xf32, #tpu.memory_space<vmem>>, vector<8x128xf32>,
    return
  }
  func.func @transform_0(%arg0: i32) -> (i32, i32) {
    %c0_i32 = arith.constant 0 : i32
    %c0_i32_0 = arith.constant 0 : i32
    return %arg0, %c0_i32 : i32, i32
  }
  func.func @transform_1(%arg0: i32) -> (i32, i32) {
    %c0_i32 = arith.constant 0 : i32
    %c0_i32_0 = arith.constant 0 : i32
    %c0_i32_1 = arith.constant 0 : i32
    return %c0_i32, %c0_i32_0 : i32, i32
  }
  func.func @transform_2(%arg0: i32) -> (i32, i32) {
    %c0_i32 = arith.constant 0 : i32
    %c0_i32_0 = arith.constant 0 : i32
    %c0_i32_1 = arith.constant 0 : i32
    return %c0_i32, %c0_i32_0 : i32, i32
  }
  func.func @transform_3(%arg0: i32) -> (i32, i32) {
    %c0_i32 = arith.constant 0 : i32
    %c0_i32_0 = arith.constant 0 : i32
    %c0_i32_1 = arith.constant 0 : i32
    return %c0_i32, %c0_i32_0 : i32, i32
  }
  func.func @transform_4(%arg0: i32) -> (i32, i32) {
    %c0_i32 = arith.constant 0 : i32
    %c0_i32_0 = arith.constant 0 : i32
    %c0_i32_1 = arith.constant 0 : i32
    return %c0_i32, %c0_i32_0 : i32, i32
  }
  func.func @transform_5(%arg0: i32) -> (i32, i32) {
    %c0_i32 = arith.constant 0 : i32
    %c0_i32_0 = arith.constant 0 : i32
    %c0_i32_1 = arith.constant 0 : i32
    return %c0_i32, %c0_i32_0 : i32, i32
  }
  func.func @transform_6(%arg0: i32) -> (i32, i32) {
    %c0_i32 = arith.constant 0 : i32
    %c0_i32_0 = arith.constant 0 : i32
    %c0_i32_1 = arith.constant 0 : i32
    return %c0_i32, %c0_i32_0 : i32, i32
  }
  func.func @transform_7(%arg0: i32) -> (i32, i32) {
    %c0_i32 = arith.constant 0 : i32
    %c0_i32_0 = arith.constant 0 : i32
    return %arg0, %c0_i32 : i32, i32
  }
}

</mosaic_0001>

<bundles_post_ra>
// kernel: fully_connected_nn.1
= control target key start
LH: loop header
LB: loop body
LE: loop exit
PB: predicated region body
PF: predicated region fallthrough
CT: control target
= control target key end

     0   :  { %12 = vsyncpa [#allocation3], 0  ;;  %s2264_s0 = inlined_call_operand.vmem [shape: f32[8,784], index: 0, kind: input, shape index: {}]   ;;  %s2265_s1 = inlined_call_operand.hbm [shape: f32[784,512], index: 1, kind: input, shape index: {}]   ;;  %s2266_s2 = inlined_call_operand.hbm [shape: f32[1,512], index: 2, kind: input, shape index: {}]   ;;  %s2267_s3 = inlined_call_operand.hbm [shape: f32[512,512], index: 3, kind: input, shape index: {}]   ;;  %s2268_s4 = inlined_call_operand.hbm [shape: f32[1,512], index: 4, kind: input, shape index: {}]   ;;  %s2269_s5 = inlined_call_operand.hbm [shape: f32[512,128], index: 5, kind: input, shape index: {}]   ;;  %s2270_s6 = inlined_call_operand.hbm [shape: f32[1,128], index: 6, kind: input, shape index: {}]   ;;  %s2271_s7 = inlined_call_operand.vmem [shape: f32[8,128], index: 7, kind: output, shape index: {}]  }
   0x1   :  { %13 = vsyncpa [#allocation5], 0 }
   0x2   :  { %14 = vsyncpa [#allocation8], 0 }
   0x3   :  { %15 = vsyncpa [#allocation11], 0  ;;  %s2100_s24 = smov [#allocation4]   ;;  %s2101_s26 = smov [#allocation7]  }
   0x4   :  { %s36_s25 = sshll.u32 %s2100_s24, 4  ;;  %s58_s27 = sshll.u32 %s2101_s26, 4  ;;  %s37_s25 = int_to_ptr.vmem [resolvable:$true] %s36_s25  ;;  %s59_s27 = int_to_ptr.vmem [resolvable:$true] %s58_s27 }
   0x5   :  { %s1980_s28 = scalar_lea.vmem %s37_s25, 64  ;;  %p1985_p1 = scmp.lt.s32.totalorder %s37_s25, %s37_s25 }
   0x6   :  { %p1981_p0 = scmp.ne.s32.totalorder %s37_s25, %s1980_s28  ;;  %p1986_p2 = scmp.lt.s32.totalorder %s1980_s28, %s1980_s28 }
   0x8   :  { %p1987_p3 = por %p1986_p2, %p1985_p1 }
   0xa   :  { %p1988_p4 = pnand %p1987_p3, %p1981_p0 }
   0xc   :  { %1991 = shalt.err (!%p1988_p4)
}
   0xd   :  { %39 = dma.hbm_to_vmem [thread:$0]  %s2266_s2, 64, %s37_s25, [#allocation5]  }
   0xe   :  { %s2000_s8 = scalar_lea.vmem %s59_s27, 64  ;;  %p2005_p6 = scmp.lt.s32.totalorder %s59_s27, %s59_s27 }
   0xf   :  { %p2001_p5 = scmp.ne.s32.totalorder %s59_s27, %s2000_s8  ;;  %p2006_p7 = scmp.lt.s32.totalorder %s2000_s8, %s2000_s8 }
  0x11   :  { %p2007_p8 = por %p2006_p7, %p2005_p6 }
  0x13   :  { %p2008_p9 = pnand %p2007_p8, %p2001_p5 }
  0x15   :  { %2011 = shalt.err (!%p2008_p9)
}
  0x16   :  { %61 = dma.hbm_to_vmem [thread:$0]  %s2268_s4, 64, %s59_s27, [#allocation8]  }
  0x17   :  { %s2102_s11 = smov [#allocation2]  }
  0x18   :  { %s23_s12 = sshll.u32 %s2102_s11, 4  ;;  %s24_s12 = int_to_ptr.vmem [resolvable:$true] %s23_s12 }
  0x19   :  { %s2020_s13 = scalar_lea.vmem %s24_s12, 50176  ;;  %p2025_p11 = scmp.lt.s32.totalorder %s24_s12, %s24_s12 }
  0x1a   :  { %p2021_p10 = scmp.ne.s32.totalorder %s24_s12, %s2020_s13  ;;  %p2026_p12 = scmp.lt.s32.totalorder %s2020_s13, %s2020_s13 }
  0x1c   :  { %p2027_p13 = por %p2026_p12, %p2025_p11 }
  0x1e   :  { %p2028_p0 = pnand %p2027_p13, %p2021_p10 }
  0x20   :  { %2031 = shalt.err (!%p2028_p0)
}
  0x21   :  { %s2103_s2 = smov 512   ;;  %s2104_s14 = smov 32  }
  0x22   :  { %29 = dma.hbm_to_vmem [thread:$0]  %s2265_s1, 50176, %s24_s12, [#allocation3], %s2103_s2, %s2103_s2, %s2104_s14  }
  0x23   :  { %s2105_s17 = smov [#allocation6]   ;;  %s2106_s4 = smov [#allocation9]  }
  0x24   :  { %s45_s18 = sshll.u32 %s2105_s17, 4  ;;  %s67_s19 = sshll.u32 %s2106_s4, 4  ;;  %s46_s18 = int_to_ptr.vmem [resolvable:$true] %s45_s18  ;;  %s68_s19 = int_to_ptr.vmem [resolvable:$true] %s67_s19 }
  0x25   :  { %s2040_s20 = scalar_lea.vmem %s46_s18, 32768  ;;  %p2045_p2 = scmp.lt.s32.totalorder %s46_s18, %s46_s18 }
  0x26   :  { %p2041_p1 = scmp.ne.s32.totalorder %s46_s18, %s2040_s20  ;;  %p2046_p3 = scmp.lt.s32.totalorder %s2040_s20, %s2040_s20 }
  0x28   :  { %p2047_p4 = por %p2046_p3, %p2045_p2 }
  0x2a   :  { %p2048_p5 = pnand %p2047_p4, %p2041_p1 }
  0x2c   :  { %2051 = shalt.err (!%p2048_p5)
}
  0x2d   :  { %51 = dma.hbm_to_vmem [thread:$0]  %s2267_s3, 32768, %s46_s18, [#allocation5], %s2103_s2, %s2103_s2, %s2104_s14  }
  0x2e   :  { %s2060_s23 = scalar_lea.vmem %s68_s19, 8192  ;;  %p2065_p7 = scmp.lt.s32.totalorder %s68_s19, %s68_s19 }
  0x2f   :  { %p2061_p6 = scmp.ne.s32.totalorder %s68_s19, %s2060_s23  ;;  %p2066_p8 = scmp.lt.s32.totalorder %s2060_s23, %s2060_s23 }
  0x31   :  { %p2067_p9 = por %p2066_p8, %p2065_p7 }
  0x33   :  { %p2068_p10 = pnand %p2067_p9, %p2061_p6 }
  0x35   :  { %2071 = shalt.err (!%p2068_p10)
}
  0x36   :  { %s2107_s1 = smov 128   ;;  %s2108_s24 = smov 8  }
  0x37   :  { %73 = dma.hbm_to_vmem [thread:$0]  %s2269_s5, 8192, %s68_s19, [#allocation8], %s2107_s1, %s2107_s1, %s2108_s24  }
  0x38   :  { %s2109_s27 = smov [#allocation10]  }
  0x39   :  { %s80_s28 = sshll.u32 %s2109_s27, 4  ;;  %s81_s28 = int_to_ptr.vmem [resolvable:$true] %s80_s28 }
  0x3a   :  { %s2080_s29 = scalar_lea.vmem %s81_s28, 16  ;;  %s2084_s3 = scalar_lea.vmem %s81_s28, 32 }
  0x3b   :  { %p2081_p11 = scmp.ne.s32.totalorder %s81_s28, %s2080_s29  ;;  %p2085_p12 = scmp.lt.s32.totalorder %s81_s28, %s81_s28 }
  0x3c   :  { %p2086_p13 = scmp.lt.s32.totalorder %s2084_s3, %s2080_s29 }
  0x3e   :  { %p2087_p0 = por %p2086_p13, %p2085_p12 }
  0x40   :  { %p2088_p1 = pnand %p2087_p0, %p2081_p11 }
  0x42   :  { %2091 = shalt.err (!%p2088_p1)
}
  0x43   :  { %83 = dma.hbm_to_vmem [thread:$0]  %s2270_s6, 16, %s81_s28, [#allocation11]  }
  0x44   :  { %2092 = dma.done.wait [#allocation3], 50176  }
  0x45   :  { %2093 = vsyncadd [#allocation3], 4294917120 }
  0x46   :  { %2094 = dma.done.wait [#allocation5], 32832  }
  0x47   :  { %2095 = vsyncadd [#allocation5], 4294934464 }
  0x48   :  { %2096 = dma.done.wait [#allocation8], 8256  }
  0x49   :  { %2097 = vsyncadd [#allocation8], 4294959040 }
  0x4a   :  { %2098 = dma.done.wait [#allocation11], 16  }
  0x4b   :  { %2099 = vsyncadd [#allocation11], 4294967280  ;;  %v170_v0 = vld [vmem:[#allocation2 + $0x1e8] sm:$0xff]  ;;  %v169_v2 = vld [vmem:[#allocation2 + $0x1e0] sm:$0xff]  ;;  %vm523_vm0 = vcmask 130048  }
  0x4c   :  { %v298_v1 = vld [vmem:[#allocation2 + $0x5e8] sm:$0xff]  ;;  %527 = vmatprep.subr.mxu0 %v170_v0  ;;  %v297_v3 = vld [vmem:[#allocation2 + $0x5e0] sm:$0xff] }
  0x4d   :  { %598 = vmatprep.subr.mxu1 %v298_v1  ;;  %v166_v4 = vld [vmem:[#allocation2 + $0x1c8] sm:$0xff]  ;;  %528 = vmatpush1.msra.mxu0 %v169_v2  ;;  %v165_v6 = vld [vmem:[#allocation2 + $0x1c0] sm:$0xff] }
  0x4e   :  { %v294_v5 = vld [vmem:[#allocation2 + $0x5c8] sm:$0xff]  ;;  %599 = vmatpush1.msra.mxu1 %v297_v3  ;;  %v293_v7 = vld [vmem:[#allocation2 + $0x5c0] sm:$0xff]  ;;  %529 = vmatprep.subr.mxu0 %v166_v4 }
  0x4f   :  { %v162_v8 = vld [vmem:[#allocation2 + $0x1a8] sm:$0xff]  ;;  %600 = vmatprep.subr.mxu1 %v294_v5  ;;  %v161_v10 = vld [vmem:[#allocation2 + $0x1a0] sm:$0xff]  ;;  %530 = vmatpush1.msra.mxu0 %v165_v6 }
  0x50   :  { %v290_v9 = vld [vmem:[#allocation2 + $0x5a8] sm:$0xff]  ;;  %v289_v11 = vld [vmem:[#allocation2 + $0x5a0] sm:$0xff]  ;;  %601 = vmatpush1.msra.mxu1 %v293_v7  ;;  %531 = vmatprep.subr.mxu0 %v162_v8 }
  0x51   :  { %v158_v12 = vld [vmem:[#allocation2 + $0x188] sm:$0xff]  ;;  %602 = vmatprep.subr.mxu1 %v290_v9  ;;  %v157_v14 = vld [vmem:[#allocation2 + $0x180] sm:$0xff]  ;;  %532 = vmatpush1.msra.mxu0 %v161_v10 }
  0x52   :  { %v286_v13 = vld [vmem:[#allocation2 + $0x588] sm:$0xff]  ;;  %v285_v15 = vld [vmem:[#allocation2 + $0x580] sm:$0xff]  ;;  %603 = vmatpush1.msra.mxu1 %v289_v11  ;;  %533 = vmatprep.subr.mxu0 %v158_v12 }
  0x53   :  { %v154_v16 = vld [vmem:[#allocation2 + $0x168] sm:$0xff]  ;;  %604 = vmatprep.subr.mxu1 %v286_v13  ;;  %v153_v18 = vld [vmem:[#allocation2 + $0x160] sm:$0xff]  ;;  %534 = vmatpush1.msra.mxu0 %v157_v14 }
  0x54   :  { %v282_v17 = vld [vmem:[#allocation2 + $0x568] sm:$0xff]  ;;  %v281_v19 = vld [vmem:[#allocation2 + $0x560] sm:$0xff]  ;;  %605 = vmatpush1.msra.mxu1 %v285_v15  ;;  %535 = vmatprep.subr.mxu0 %v154_v16 }
  0x55   :  { %v150_v20 = vld [vmem:[#allocation2 + $0x148] sm:$0xff]  ;;  %606 = vmatprep.subr.mxu1 %v282_v17  ;;  %v149_v22 = vld [vmem:[#allocation2 + $0x140] sm:$0xff]  ;;  %536 = vmatpush1.msra.mxu0 %v153_v18 }
  0x56   :  { %v278_v21 = vld [vmem:[#allocation2 + $0x548] sm:$0xff]  ;;  %v277_v23 = vld [vmem:[#allocation2 + $0x540] sm:$0xff]  ;;  %607 = vmatpush1.msra.mxu1 %v281_v19  ;;  %537 = vmatprep.subr.mxu0 %v150_v20 }
  0x57   :  { %v146_v24 = vld [vmem:[#allocation2 + $0x128] sm:$0xff]  ;;  %608 = vmatprep.subr.mxu1 %v278_v21  ;;  %v145_v26 = vld [vmem:[#allocation2 + $0x120] sm:$0xff]  ;;  %538 = vmatpush1.msra.mxu0 %v149_v22 }
  0x58   :  { %v274_v25 = vld [vmem:[#allocation2 + $0x528] sm:$0xff]  ;;  %v273_v27 = vld [vmem:[#allocation2 + $0x520] sm:$0xff]  ;;  %609 = vmatpush1.msra.mxu1 %v277_v23  ;;  %539 = vmatprep.subr.mxu0 %v146_v24 }
  0x59   :  { %v142_v28 = vld [vmem:[#allocation2 + $0x108] sm:$0xff]  ;;  %610 = vmatprep.subr.mxu1 %v274_v25  ;;  %v141_v30 = vld [vmem:[#allocation2 + $0x100] sm:$0xff]  ;;  %540 = vmatpush1.msra.mxu0 %v145_v26 }
  0x5a   :  { %v270_v29 = vld [vmem:[#allocation2 + $0x508] sm:$0xff]  ;;  %v269_v31 = vld [vmem:[#allocation2 + $0x500] sm:$0xff]  ;;  %611 = vmatpush1.msra.mxu1 %v273_v27  ;;  %541 = vmatprep.subr.mxu0 %v142_v28 }
  0x5b   :  { %v138_v32 = vld [vmem:[#allocation2 + $0xe8] sm:$0xff]  ;;  %612 = vmatprep.subr.mxu1 %v270_v29  ;;  %v137_v34 = vld [vmem:[#allocation2 + $0xe0] sm:$0xff]  ;;  %542 = vmatpush1.msra.mxu0 %v141_v30 }
  0x5c   :  { %v266_v33 = vld [vmem:[#allocation2 + $0x4e8] sm:$0xff]  ;;  %v265_v35 = vld [vmem:[#allocation2 + $0x4e0] sm:$0xff]  ;;  %613 = vmatpush1.msra.mxu1 %v269_v31  ;;  %543 = vmatprep.subr.mxu0 %v138_v32 }
  0x5d   :  { %v134_v36 = vld [vmem:[#allocation2 + $0xc8] sm:$0xff]  ;;  %614 = vmatprep.subr.mxu1 %v266_v33  ;;  %v133_v38 = vld [vmem:[#allocation2 + $0xc0] sm:$0xff]  ;;  %544 = vmatpush1.msra.mxu0 %v137_v34 }
  0x5e   :  { %v262_v37 = vld [vmem:[#allocation2 + $0x4c8] sm:$0xff]  ;;  %v261_v39 = vld [vmem:[#allocation2 + $0x4c0] sm:$0xff]  ;;  %615 = vmatpush1.msra.mxu1 %v265_v35  ;;  %545 = vmatprep.subr.mxu0 %v134_v36 }
  0x5f   :  { %v130_v40 = vld [vmem:[#allocation2 + $0xa8] sm:$0xff]  ;;  %616 = vmatprep.subr.mxu1 %v262_v37  ;;  %v129_v42 = vld [vmem:[#allocation2 + $0xa0] sm:$0xff]  ;;  %546 = vmatpush1.msra.mxu0 %v133_v38 }
  0x60   :  { %v258_v41 = vld [vmem:[#allocation2 + $0x4a8] sm:$0xff]  ;;  %v257_v43 = vld [vmem:[#allocation2 + $0x4a0] sm:$0xff]  ;;  %617 = vmatpush1.msra.mxu1 %v261_v39  ;;  %547 = vmatprep.subr.mxu0 %v130_v40 }
  0x61   :  { %v126_v44 = vld [vmem:[#allocation2 + $0x88] sm:$0xff]  ;;  %618 = vmatprep.subr.mxu1 %v258_v41  ;;  %v125_v46 = vld [vmem:[#allocation2 + $0x80] sm:$0xff]  ;;  %548 = vmatpush1.msra.mxu0 %v129_v42 }
  0x62   :  { %v254_v45 = vld [vmem:[#allocation2 + $0x488] sm:$0xff]  ;;  %v253_v47 = vld [vmem:[#allocation2 + $0x480] sm:$0xff]  ;;  %619 = vmatpush1.msra.mxu1 %v257_v43  ;;  %549 = vmatprep.subr.mxu0 %v126_v44 }
  0x63   :  { %v122_v48 = vld [vmem:[#allocation2 + $0x68] sm:$0xff]  ;;  %620 = vmatprep.subr.mxu1 %v254_v45  ;;  %v121_v50 = vld [vmem:[#allocation2 + $0x60] sm:$0xff]  ;;  %550 = vmatpush1.msra.mxu0 %v125_v46 }
  0x64   :  { %v250_v49 = vld [vmem:[#allocation2 + $0x468] sm:$0xff]  ;;  %v249_v51 = vld [vmem:[#allocation2 + $0x460] sm:$0xff]  ;;  %621 = vmatpush1.msra.mxu1 %v253_v47  ;;  %551 = vmatprep.subr.mxu0 %v122_v48 }
  0x65   :  { %v118_v52 = vld [vmem:[#allocation2 + $0x48] sm:$0xff]  ;;  %622 = vmatprep.subr.mxu1 %v250_v49  ;;  %v117_v54 = vld [vmem:[#allocation2 + $0x40] sm:$0xff]  ;;  %552 = vmatpush1.msra.mxu0 %v121_v50 }
  0x66   :  { %v246_v53 = vld [vmem:[#allocation2 + $0x448] sm:$0xff]  ;;  %v245_v55 = vld [vmem:[#allocation2 + $0x440] sm:$0xff]  ;;  %623 = vmatpush1.msra.mxu1 %v249_v51  ;;  %553 = vmatprep.subr.mxu0 %v118_v52 }
  0x67   :  { %v114_v56 = vld [vmem:[#allocation2 + $0x28] sm:$0xff]  ;;  %624 = vmatprep.subr.mxu1 %v246_v53  ;;  %v113_v58 = vld [vmem:[#allocation2 + $0x20] sm:$0xff]  ;;  %554 = vmatpush1.msra.mxu0 %v117_v54 }
  0x68   :  { %v242_v57 = vld [vmem:[#allocation2 + $0x428] sm:$0xff]  ;;  %v241_v59 = vld [vmem:[#allocation2 + $0x420] sm:$0xff]  ;;  %625 = vmatpush1.msra.mxu1 %v245_v55  ;;  %555 = vmatprep.subr.mxu0 %v114_v56 }
  0x69   :  { %v110_v60 = vld [vmem:[#allocation2 + $0x8] sm:$0xff]  ;;  %626 = vmatprep.subr.mxu1 %v242_v57  ;;  %v109_v62 = vld [vmem:[#allocation2] sm:$0xff]  ;;  %556 = vmatpush1.msra.mxu0 %v113_v58 }
  0x6a   :  { %v238_v61 = vld [vmem:[#allocation2 + $0x408] sm:$0xff]  ;;  %v237_v63 = vld [vmem:[#allocation2 + $0x400] sm:$0xff]  ;;  %627 = vmatpush1.msra.mxu1 %v241_v59  ;;  %557 = vmatprep.subr.mxu0 %v110_v60 }
  0x6b   :  { %v234_v0 = vld [vmem:[#allocation2 + $0x3e8] sm:$0xff]  ;;  %628 = vmatprep.subr.mxu1 %v238_v61  ;;  %v233_v2 = vld [vmem:[#allocation2 + $0x3e0] sm:$0xff]  ;;  %558 = vmatpush1.msra.mxu0 %v109_v62 }
  0x6c   :  { %v362_v1 = vld [vmem:[#allocation2 + $0x7e8] sm:$0xff]  ;;  %v361_v3 = vld [vmem:[#allocation2 + $0x7e0] sm:$0xff]  ;;  %629 = vmatpush1.msra.mxu1 %v237_v63  ;;  %559 = vmatprep.subr.mxu0 %v234_v0 }
  0x6d   :  { %v230_v4 = vld [vmem:[#allocation2 + $0x3c8] sm:$0xff]  ;;  %630 = vmatprep.subr.mxu1 %v362_v1  ;;  %v229_v6 = vld [vmem:[#allocation2 + $0x3c0] sm:$0xff]  ;;  %560 = vmatpush2.msra.mxu0 %v233_v2  ;;  %v105_v1 = vld [vmem:[%s2264_s0 + $0x18] sm:$0xff] }
  0x6e   :  { %v358_v5 = vld [vmem:[#allocation2 + $0x7c8] sm:$0xff]  ;;  %v357_v7 = vld [vmem:[#allocation2 + $0x7c0] sm:$0xff]  ;;  %631 = vmatpush2.msra.mxu1 %v361_v3  ;;  %561 = vmatprep.subr.mxu0 %v230_v4  ;;  %v104_v3 = vld [vmem:[%s2264_s0 + $0x10] sm:$0xff] }
  0x6f   :  { %v226_v8 = vld [vmem:[#allocation2 + $0x3a8] sm:$0xff]  ;;  %632 = vmatprep.subr.mxu1 %v358_v5  ;;  %v225_v10 = vld [vmem:[#allocation2 + $0x3a0] sm:$0xff]  ;;  %562 = vmatpush2.msra.mxu0 %v229_v6 }
  0x70   :  { %v354_v9 = vld [vmem:[#allocation2 + $0x7a8] sm:$0xff]  ;;  %v353_v11 = vld [vmem:[#allocation2 + $0x7a0] sm:$0xff]  ;;  %633 = vmatpush2.msra.mxu1 %v357_v7  ;;  %563 = vmatprep.subr.mxu0 %v226_v8 }
  0x71   :  { %v222_v12 = vld [vmem:[#allocation2 + $0x388] sm:$0xff]  ;;  %634 = vmatprep.subr.mxu1 %v354_v9  ;;  %v221_v14 = vld [vmem:[#allocation2 + $0x380] sm:$0xff]  ;;  %564 = vmatpush2.msra.mxu0 %v225_v10 }
  0x72   :  { %v350_v13 = vld [vmem:[#allocation2 + $0x788] sm:$0xff]  ;;  %v349_v15 = vld [vmem:[#allocation2 + $0x780] sm:$0xff]  ;;  %635 = vmatpush2.msra.mxu1 %v353_v11  ;;  %565 = vmatprep.subr.mxu0 %v222_v12 }
  0x73   :  { %v218_v16 = vld [vmem:[#allocation2 + $0x368] sm:$0xff]  ;;  %636 = vmatprep.subr.mxu1 %v350_v13  ;;  %v217_v18 = vld [vmem:[#allocation2 + $0x360] sm:$0xff]  ;;  %566 = vmatpush2.msra.mxu0 %v221_v14  ;;  %v108_v13 = vld [vmem:[%s2264_s0 + $0x30] sm:$0xff] }
  0x74   :  { %v346_v17 = vld [vmem:[#allocation2 + $0x768] sm:$0xff]  ;;  %v345_v19 = vld [vmem:[#allocation2 + $0x760] sm:$0xff]  ;;  %637 = vmatpush2.msra.mxu1 %v349_v15  ;;  %567 = vmatprep.subr.mxu0 %v218_v16  ;;  %v172_v14 = vld [vmem:[#allocation2 + $0x1f8] sm:$0xff] }
  0x75   :  { %v214_v20 = vld [vmem:[#allocation2 + $0x348] sm:$0xff]  ;;  %638 = vmatprep.subr.mxu1 %v346_v17  ;;  %v213_v22 = vld [vmem:[#allocation2 + $0x340] sm:$0xff]  ;;  %568 = vmatpush2.msra.mxu0 %v217_v18  ;;  %v171_v16 = vld [vmem:[#allocation2 + $0x1f0] sm:$0xff]  ;;  %v2110_v17 = vmov 0.0  }
  0x76   :  { %v342_v21 = vld [vmem:[#allocation2 + $0x748] sm:$0xff]  ;;  %v341_v23 = vld [vmem:[#allocation2 + $0x740] sm:$0xff]  ;;  %639 = vmatpush2.msra.mxu1 %v345_v19  ;;  %569 = vmatprep.subr.mxu0 %v214_v20  ;;  %v168_v19 = vld [vmem:[#allocation2 + $0x1d8] sm:$0xff] }
  0x77   :  { %v210_v24 = vld [vmem:[#allocation2 + $0x328] sm:$0xff]  ;;  %640 = vmatprep.subr.mxu1 %v342_v21  ;;  %v209_v26 = vld [vmem:[#allocation2 + $0x320] sm:$0xff]  ;;  %570 = vmatpush2.msra.mxu0 %v213_v22  ;;  %v167_v21 = vld [vmem:[#allocation2 + $0x1d0] sm:$0xff] }
  0x78   :  { %v338_v25 = vld [vmem:[#allocation2 + $0x728] sm:$0xff]  ;;  %v337_v27 = vld [vmem:[#allocation2 + $0x720] sm:$0xff]  ;;  %641 = vmatpush2.msra.mxu1 %v341_v23  ;;  %571 = vmatprep.subr.mxu0 %v210_v24  ;;  %v164_v23 = vld [vmem:[#allocation2 + $0x1b8] sm:$0xff] }
  0x79   :  { %v206_v28 = vld [vmem:[#allocation2 + $0x308] sm:$0xff]  ;;  %642 = vmatprep.subr.mxu1 %v338_v25  ;;  %v205_v30 = vld [vmem:[#allocation2 + $0x300] sm:$0xff]  ;;  %572 = vmatpush2.msra.mxu0 %v209_v26  ;;  %v163_v25 = vld [vmem:[#allocation2 + $0x1b0] sm:$0xff] }
  0x7a   :  { %v334_v29 = vld [vmem:[#allocation2 + $0x708] sm:$0xff]  ;;  %v333_v31 = vld [vmem:[#allocation2 + $0x700] sm:$0xff]  ;;  %643 = vmatpush2.msra.mxu1 %v337_v27  ;;  %573 = vmatprep.subr.mxu0 %v206_v28  ;;  %v160_v27 = vld [vmem:[#allocation2 + $0x198] sm:$0xff] }
  0x7b   :  { %v202_v32 = vld [vmem:[#allocation2 + $0x2e8] sm:$0xff]  ;;  %644 = vmatprep.subr.mxu1 %v334_v29  ;;  %v201_v34 = vld [vmem:[#allocation2 + $0x2e0] sm:$0xff]  ;;  %574 = vmatpush2.msra.mxu0 %v205_v30  ;;  %v159_v29 = vld [vmem:[#allocation2 + $0x190] sm:$0xff] }
  0x7c   :  { %v330_v33 = vld [vmem:[#allocation2 + $0x6e8] sm:$0xff]  ;;  %v329_v35 = vld [vmem:[#allocation2 + $0x6e0] sm:$0xff]  ;;  %645 = vmatpush2.msra.mxu1 %v333_v31  ;;  %575 = vmatprep.subr.mxu0 %v202_v32  ;;  %v156_v31 = vld [vmem:[#allocation2 + $0x178] sm:$0xff] }
  0x7d   :  { %v198_v36 = vld [vmem:[#allocation2 + $0x2c8] sm:$0xff]  ;;  %646 = vmatprep.subr.mxu1 %v330_v33  ;;  %v197_v38 = vld [vmem:[#allocation2 + $0x2c0] sm:$0xff]  ;;  %576 = vmatpush2.msra.mxu0 %v201_v34  ;;  %v155_v33 = vld [vmem:[#allocation2 + $0x170] sm:$0xff] }
  0x7e   :  { %v326_v37 = vld [vmem:[#allocation2 + $0x6c8] sm:$0xff]  ;;  %v325_v39 = vld [vmem:[#allocation2 + $0x6c0] sm:$0xff]  ;;  %647 = vmatpush2.msra.mxu1 %v329_v35  ;;  %577 = vmatprep.subr.mxu0 %v198_v36  ;;  %v152_v35 = vld [vmem:[#allocation2 + $0x158] sm:$0xff] }
  0x7f   :  { %v194_v40 = vld [vmem:[#allocation2 + $0x2a8] sm:$0xff]  ;;  %648 = vmatprep.subr.mxu1 %v326_v37  ;;  %v193_v42 = vld [vmem:[#allocation2 + $0x2a0] sm:$0xff]  ;;  %578 = vmatpush2.msra.mxu0 %v197_v38  ;;  %v151_v37 = vld [vmem:[#allocation2 + $0x150] sm:$0xff] }
  0x80   :  { %v322_v41 = vld [vmem:[#allocation2 + $0x6a8] sm:$0xff]  ;;  %v321_v43 = vld [vmem:[#allocation2 + $0x6a0] sm:$0xff]  ;;  %649 = vmatpush2.msra.mxu1 %v325_v39  ;;  %579 = vmatprep.subr.mxu0 %v194_v40  ;;  %v148_v39 = vld [vmem:[#allocation2 + $0x138] sm:$0xff] }
  0x81   :  { %v190_v44 = vld [vmem:[#allocation2 + $0x288] sm:$0xff]  ;;  %650 = vmatprep.subr.mxu1 %v322_v41  ;;  %v189_v46 = vld [vmem:[#allocation2 + $0x280] sm:$0xff]  ;;  %580 = vmatpush2.msra.mxu0 %v193_v42  ;;  %v147_v41 = vld [vmem:[#allocation2 + $0x130] sm:$0xff] }
  0x82   :  { %v318_v45 = vld [vmem:[#allocation2 + $0x688] sm:$0xff]  ;;  %v317_v47 = vld [vmem:[#allocation2 + $0x680] sm:$0xff]  ;;  %651 = vmatpush2.msra.mxu1 %v321_v43  ;;  %581 = vmatprep.subr.mxu0 %v190_v44  ;;  %v144_v43 = vld [vmem:[#allocation2 + $0x118] sm:$0xff] }
  0x83   :  { %v186_v48 = vld [vmem:[#allocation2 + $0x268] sm:$0xff]  ;;  %652 = vmatprep.subr.mxu1 %v318_v45  ;;  %v185_v50 = vld [vmem:[#allocation2 + $0x260] sm:$0xff]  ;;  %582 = vmatpush2.msra.mxu0 %v189_v46  ;;  %v143_v45 = vld [vmem:[#allocation2 + $0x110] sm:$0xff] }
  0x84   :  { %v314_v49 = vld [vmem:[#allocation2 + $0x668] sm:$0xff]  ;;  %v313_v51 = vld [vmem:[#allocation2 + $0x660] sm:$0xff]  ;;  %653 = vmatpush2.msra.mxu1 %v317_v47  ;;  %583 = vmatprep.subr.mxu0 %v186_v48  ;;  %v140_v47 = vld [vmem:[#allocation2 + $0xf8] sm:$0xff] }
  0x85   :  { %v182_v52 = vld [vmem:[#allocation2 + $0x248] sm:$0xff]  ;;  %654 = vmatprep.subr.mxu1 %v314_v49  ;;  %v181_v54 = vld [vmem:[#allocation2 + $0x240] sm:$0xff]  ;;  %584 = vmatpush2.msra.mxu0 %v185_v50  ;;  %v139_v49 = vld [vmem:[#allocation2 + $0xf0] sm:$0xff] }
  0x86   :  { %v310_v53 = vld [vmem:[#allocation2 + $0x648] sm:$0xff]  ;;  %v309_v55 = vld [vmem:[#allocation2 + $0x640] sm:$0xff]  ;;  %655 = vmatpush2.msra.mxu1 %v313_v51  ;;  %585 = vmatprep.subr.mxu0 %v182_v52  ;;  %v136_v51 = vld [vmem:[#allocation2 + $0xd8] sm:$0xff] }
  0x87   :  { %v178_v56 = vld [vmem:[#allocation2 + $0x228] sm:$0xff]  ;;  %656 = vmatprep.subr.mxu1 %v310_v53  ;;  %v177_v58 = vld [vmem:[#allocation2 + $0x220] sm:$0xff]  ;;  %586 = vmatpush2.msra.mxu0 %v181_v54  ;;  %v135_v53 = vld [vmem:[#allocation2 + $0xd0] sm:$0xff] }
  0x88   :  { %v306_v57 = vld [vmem:[#allocation2 + $0x628] sm:$0xff]  ;;  %v305_v59 = vld [vmem:[#allocation2 + $0x620] sm:$0xff]  ;;  %657 = vmatpush2.msra.mxu1 %v309_v55  ;;  %587 = vmatprep.subr.mxu0 %v178_v56  ;;  %v132_v55 = vld [vmem:[#allocation2 + $0xb8] sm:$0xff] }
  0x89   :  { %v174_v60 = vld [vmem:[#allocation2 + $0x208] sm:$0xff]  ;;  %658 = vmatprep.subr.mxu1 %v306_v57  ;;  %v173_v62 = vld [vmem:[#allocation2 + $0x200] sm:$0xff]  ;;  %588 = vmatpush2.msra.mxu0 %v177_v58  ;;  %v131_v57 = vld [vmem:[#allocation2 + $0xb0] sm:$0xff] }
  0x8a   :  { %v302_v61 = vld [vmem:[#allocation2 + $0x608] sm:$0xff]  ;;  %659 = vmatpush2.msra.mxu1 %v305_v59  ;;  %v301_v0 = vld [vmem:[#allocation2 + $0x600] sm:$0xff]  ;;  %589 = vmatprep.subr.mxu0 %v174_v60  ;;  %v128_v59 = vld [vmem:[#allocation2 + $0x98] sm:$0xff] }
  0x8b   :  { %v2172_v63 = vld [vmem:[%s2264_s0 + $0x8] sm:$0xff]  ;;  %660 = vmatprep.subr.mxu1 %v302_v61  ;;  %v2180_v2 = vld [vmem:[%s2264_s0] sm:$0xff]  ;;  %590 = vmatpush2.msra.mxu0 %v173_v62  ;;  %v127_v61 = vld [vmem:[#allocation2 + $0x90] sm:$0xff] }
  0x8c   :  { %591 = vmatprep.mubr.f32.mxu0 %v2172_v63  ;;  %v426_v4 = vld [vmem:[#allocation2 + $0x9e8] sm:$0xff]  ;;  %661 = vmatpush2.msra.mxu1 %v301_v0  ;;  %v425_v6 = vld [vmem:[#allocation2 + $0x9e0] sm:$0xff]  ;;  %v124_v0 = vld [vmem:[#allocation2 + $0x78] sm:$0xff] }
  0x8d   :  { %v498_v5 = vld [vmem:[#allocation2 + $0xc28] sm:$0xff]  ;;  %662 = vmatprep.mubr.f32.mxu1 %v105_v1  ;;  %v497_v7 = vld [vmem:[#allocation2 + $0xc20] sm:$0xff]  ;;  %592 = vmatmul.mubr.f32.vlgmr.msra.gmra.mxu0 %v2180_v2 }
  0x8e   :  { %663 = vmatmul.mubr.f32.vlgmr.msra.gmra.mxu1 %v104_v3  ;;  %v422_v8 = vld [vmem:[#allocation2 + $0x9c8] sm:$0xff]  ;;  %669 = vmatprep.subr.mxu0 %v426_v4  ;;  %v421_v10 = vld [vmem:[#allocation2 + $0x9c0] sm:$0xff]  ;;  %v123_v3 = vld [vmem:[#allocation2 + $0x70] sm:$0xff] }
  0x8f   :  { %v494_v9 = vld [vmem:[#allocation2 + $0xc08] sm:$0xff]  ;;  %768 = vmatprep.subr.mxu1 %v498_v5  ;;  %v493_v11 = vld [vmem:[#allocation2 + $0xc00] sm:$0xff]  ;;  %670 = vmatpush1.msra.mxu0 %v425_v6  ;;  %v120_v5 = vld [vmem:[#allocation2 + $0x58] sm:$0xff] }
  0x90   :  { %769 = vmatpush1.msra.mxu1 %v497_v7  ;;  %v418_v12 = vld [vmem:[#allocation2 + $0x9a8] sm:$0xff]  ;;  %671 = vmatprep.subr.mxu0 %v422_v8  ;;  %v417_v15 = vld [vmem:[#allocation2 + $0x9a0] sm:$0xff]  ;;  %v119_v7 = vld [vmem:[#allocation2 + $0x50] sm:$0xff] }
  0x91   :  { %770 = vmatprep.subr.mxu1 %v494_v9  ;;  %672 = vmatpush1.msra.mxu0 %v421_v10  ;;  %v414_v18 = vld [vmem:[#allocation2 + $0x988] sm:$0xff]  ;;  %v413_v20 = vld [vmem:[#allocation2 + $0x980] sm:$0xff]  ;;  %v116_v9 = vld [vmem:[#allocation2 + $0x38] sm:$0xff] }
  0x92   :  { %771 = vmatpush1.msra.mxu1 %v493_v11  ;;  %804 = vmatprep.mubr.f32.mxu1 %v2110_v17  ;;  %v410_v22 = vld [vmem:[#allocation2 + $0x968] sm:$0xff]  ;;  %v409_v24 = vld [vmem:[#allocation2 + $0x960] sm:$0xff]  ;;  %v115_v11 = vld [vmem:[#allocation2 + $0x30] sm:$0xff] }
  0x93   :  { %673 = vmatprep.subr.mxu0 %v418_v12  ;;  %1885 = vmatmul.mubr.msk.f32.vlgmr.msra.gmra.mxu1 %vm523_vm0, %v108_v13  ;;  %v406_v26 = vld [vmem:[#allocation2 + $0x948] sm:$0xff]  ;;  %v405_v28 = vld [vmem:[#allocation2 + $0x940] sm:$0xff]  ;;  %v112_v13 = vld [vmem:[#allocation2 + $0x18] sm:$0xff] }
  0x94   :  { %811 = vmatprep.subr.mxu1 %v172_v14  ;;  %674 = vmatpush1.msra.mxu0 %v417_v15  ;;  %v402_v30 = vld [vmem:[#allocation2 + $0x928] sm:$0xff]  ;;  %v401_v32 = vld [vmem:[#allocation2 + $0x920] sm:$0xff]  ;;  %v111_v15 = vld [vmem:[#allocation2 + $0x10] sm:$0xff] }
  0x95   :  { %812 = vmatpush1.msra.mxu1 %v171_v16  ;;  %675 = vmatprep.subr.mxu0 %v414_v18  ;;  %v398_v34 = vld [vmem:[#allocation2 + $0x908] sm:$0xff]  ;;  %v397_v36 = vld [vmem:[#allocation2 + $0x900] sm:$0xff]  ;;  %v236_v18 = vld [vmem:[#allocation2 + $0x3f8] sm:$0xff] }
  0x96   :  { %813 = vmatprep.subr.mxu1 %v168_v19  ;;  %676 = vmatpush1.msra.mxu0 %v413_v20  ;;  %v394_v38 = vld [vmem:[#allocation2 + $0x8e8] sm:$0xff]  ;;  %v393_v40 = vld [vmem:[#allocation2 + $0x8e0] sm:$0xff]  ;;  %v235_v20 = vld [vmem:[#allocation2 + $0x3f0] sm:$0xff] }
  0x97   :  { %814 = vmatpush1.msra.mxu1 %v167_v21  ;;  %677 = vmatprep.subr.mxu0 %v410_v22  ;;  %v390_v42 = vld [vmem:[#allocation2 + $0x8c8] sm:$0xff]  ;;  %v389_v44 = vld [vmem:[#allocation2 + $0x8c0] sm:$0xff]  ;;  %v232_v22 = vld [vmem:[#allocation2 + $0x3d8] sm:$0xff] }
  0x98   :  { %815 = vmatprep.subr.mxu1 %v164_v23  ;;  %678 = vmatpush1.msra.mxu0 %v409_v24  ;;  %v386_v46 = vld [vmem:[#allocation2 + $0x8a8] sm:$0xff]  ;;  %v385_v48 = vld [vmem:[#allocation2 + $0x8a0] sm:$0xff]  ;;  %v231_v24 = vld [vmem:[#allocation2 + $0x3d0] sm:$0xff] }
  0x99   :  { %816 = vmatpush1.msra.mxu1 %v163_v25  ;;  %679 = vmatprep.subr.mxu0 %v406_v26  ;;  %v382_v50 = vld [vmem:[#allocation2 + $0x888] sm:$0xff]  ;;  %v381_v52 = vld [vmem:[#allocation2 + $0x880] sm:$0xff]  ;;  %v228_v26 = vld [vmem:[#allocation2 + $0x3b8] sm:$0xff] }
  0x9a   :  { %817 = vmatprep.subr.mxu1 %v160_v27  ;;  %680 = vmatpush1.msra.mxu0 %v405_v28  ;;  %v378_v54 = vld [vmem:[#allocation2 + $0x868] sm:$0xff]  ;;  %v377_v56 = vld [vmem:[#allocation2 + $0x860] sm:$0xff]  ;;  %v227_v28 = vld [vmem:[#allocation2 + $0x3b0] sm:$0xff] }
  0x9b   :  { %818 = vmatpush1.msra.mxu1 %v159_v29  ;;  %681 = vmatprep.subr.mxu0 %v402_v30  ;;  %v374_v58 = vld [vmem:[#allocation2 + $0x848] sm:$0xff]  ;;  %v373_v60 = vld [vmem:[#allocation2 + $0x840] sm:$0xff]  ;;  %v224_v30 = vld [vmem:[#allocation2 + $0x398] sm:$0xff] }
  0x9c   :  { %819 = vmatprep.subr.mxu1 %v156_v31  ;;  %682 = vmatpush1.msra.mxu0 %v401_v32  ;;  %v370_v62 = vld [vmem:[#allocation2 + $0x828] sm:$0xff]  ;;  %v369_v1 = vld [vmem:[#allocation2 + $0x820] sm:$0xff]  ;;  %v223_v32 = vld [vmem:[#allocation2 + $0x390] sm:$0xff] }
  0x9d   :  { %820 = vmatpush1.msra.mxu1 %v155_v33  ;;  %683 = vmatprep.subr.mxu0 %v398_v34  ;;  %v366_v4 = vld [vmem:[#allocation2 + $0x808] sm:$0xff]  ;;  %v365_v6 = vld [vmem:[#allocation2 + $0x800] sm:$0xff]  ;;  %v220_v34 = vld [vmem:[#allocation2 + $0x378] sm:$0xff] }
  0x9e   :  { %821 = vmatprep.subr.mxu1 %v152_v35  ;;  %684 = vmatpush1.msra.mxu0 %v397_v36  ;;  %v490_v8 = vld [vmem:[#allocation2 + $0xbe8] sm:$0xff]  ;;  %v489_v10 = vld [vmem:[#allocation2 + $0xbe0] sm:$0xff]  ;;  %v219_v36 = vld [vmem:[#allocation2 + $0x370] sm:$0xff] }
  0x9f   :  { %822 = vmatpush1.msra.mxu1 %v151_v37  ;;  %685 = vmatprep.subr.mxu0 %v394_v38  ;;  %v486_v12 = vld [vmem:[#allocation2 + $0xbc8] sm:$0xff]  ;;  %v485_v14 = vld [vmem:[#allocation2 + $0xbc0] sm:$0xff]  ;;  %v216_v38 = vld [vmem:[#allocation2 + $0x358] sm:$0xff] }
  0xa0   :  { %823 = vmatprep.subr.mxu1 %v148_v39  ;;  %686 = vmatpush1.msra.mxu0 %v393_v40  ;;  %v482_v16 = vld [vmem:[#allocation2 + $0xba8] sm:$0xff]  ;;  %v481_v19 = vld [vmem:[#allocation2 + $0xba0] sm:$0xff]  ;;  %v215_v40 = vld [vmem:[#allocation2 + $0x350] sm:$0xff] }
  0xa1   :  { %824 = vmatpush1.msra.mxu1 %v147_v41  ;;  %687 = vmatprep.subr.mxu0 %v390_v42  ;;  %v478_v21 = vld [vmem:[#allocation2 + $0xb88] sm:$0xff]  ;;  %v477_v23 = vld [vmem:[#allocation2 + $0xb80] sm:$0xff]  ;;  %v212_v42 = vld [vmem:[#allocation2 + $0x338] sm:$0xff] }
  0xa2   :  { %825 = vmatprep.subr.mxu1 %v144_v43  ;;  %688 = vmatpush1.msra.mxu0 %v389_v44  ;;  %v474_v25 = vld [vmem:[#allocation2 + $0xb68] sm:$0xff]  ;;  %v473_v27 = vld [vmem:[#allocation2 + $0xb60] sm:$0xff]  ;;  %v211_v44 = vld [vmem:[#allocation2 + $0x330] sm:$0xff] }
  0xa3   :  { %826 = vmatpush1.msra.mxu1 %v143_v45  ;;  %689 = vmatprep.subr.mxu0 %v386_v46  ;;  %v470_v29 = vld [vmem:[#allocation2 + $0xb48] sm:$0xff]  ;;  %v469_v31 = vld [vmem:[#allocation2 + $0xb40] sm:$0xff]  ;;  %v208_v46 = vld [vmem:[#allocation2 + $0x318] sm:$0xff] }
  0xa4   :  { %827 = vmatprep.subr.mxu1 %v140_v47  ;;  %690 = vmatpush1.msra.mxu0 %v385_v48  ;;  %v466_v33 = vld [vmem:[#allocation2 + $0xb28] sm:$0xff]  ;;  %v465_v35 = vld [vmem:[#allocation2 + $0xb20] sm:$0xff]  ;;  %v207_v48 = vld [vmem:[#allocation2 + $0x310] sm:$0xff] }
  0xa5   :  { %828 = vmatpush1.msra.mxu1 %v139_v49  ;;  %691 = vmatprep.subr.mxu0 %v382_v50  ;;  %v462_v37 = vld [vmem:[#allocation2 + $0xb08] sm:$0xff]  ;;  %v461_v39 = vld [vmem:[#allocation2 + $0xb00] sm:$0xff]  ;;  %v204_v50 = vld [vmem:[#allocation2 + $0x2f8] sm:$0xff] }
  0xa6   :  { %829 = vmatprep.subr.mxu1 %v136_v51  ;;  %692 = vmatpush1.msra.mxu0 %v381_v52  ;;  %v458_v41 = vld [vmem:[#allocation2 + $0xae8] sm:$0xff]  ;;  %v457_v43 = vld [vmem:[#allocation2 + $0xae0] sm:$0xff]  ;;  %v203_v52 = vld [vmem:[#allocation2 + $0x2f0] sm:$0xff] }
  0xa7   :  { %830 = vmatpush1.msra.mxu1 %v135_v53  ;;  %693 = vmatprep.subr.mxu0 %v378_v54  ;;  %v454_v45 = vld [vmem:[#allocation2 + $0xac8] sm:$0xff]  ;;  %v453_v47 = vld [vmem:[#allocation2 + $0xac0] sm:$0xff]  ;;  %v200_v54 = vld [vmem:[#allocation2 + $0x2d8] sm:$0xff] }
  0xa8   :  { %831 = vmatprep.subr.mxu1 %v132_v55  ;;  %694 = vmatpush1.msra.mxu0 %v377_v56  ;;  %v450_v49 = vld [vmem:[#allocation2 + $0xaa8] sm:$0xff]  ;;  %v449_v51 = vld [vmem:[#allocation2 + $0xaa0] sm:$0xff]  ;;  %v199_v56 = vld [vmem:[#allocation2 + $0x2d0] sm:$0xff] }
  0xa9   :  { %832 = vmatpush1.msra.mxu1 %v131_v57  ;;  %695 = vmatprep.subr.mxu0 %v374_v58  ;;  %v446_v53 = vld [vmem:[#allocation2 + $0xa88] sm:$0xff]  ;;  %v445_v55 = vld [vmem:[#allocation2 + $0xa80] sm:$0xff]  ;;  %v196_v58 = vld [vmem:[#allocation2 + $0x2b8] sm:$0xff] }
  0xaa   :  { %833 = vmatprep.subr.mxu1 %v128_v59  ;;  %696 = vmatpush1.msra.mxu0 %v373_v60  ;;  %v442_v57 = vld [vmem:[#allocation2 + $0xa68] sm:$0xff]  ;;  %v441_v59 = vld [vmem:[#allocation2 + $0xa60] sm:$0xff]  ;;  %v195_v60 = vld [vmem:[#allocation2 + $0x2b0] sm:$0xff] }
  0xab   :  { %834 = vmatpush1.msra.mxu1 %v127_v61  ;;  %697 = vmatprep.subr.mxu0 %v370_v62  ;;  %v438_v61 = vld [vmem:[#allocation2 + $0xa48] sm:$0xff]  ;;  %v192_v62 = vld [vmem:[#allocation2 + $0x298] sm:$0xff] }
  0xac   :  { %835 = vmatprep.subr.mxu1 %v124_v0  ;;  %698 = vmatpush1.msra.mxu0 %v369_v1  ;;  %v437_v0 = vld [vmem:[#allocation2 + $0xa40] sm:$0xff]  ;;  %v191_v1 = vld [vmem:[#allocation2 + $0x290] sm:$0xff] }
  0xad   :  { %836 = vmatpush1.msra.mxu1 %v123_v3  ;;  %699 = vmatprep.subr.mxu0 %v366_v4  ;;  %v434_v3 = vld [vmem:[#allocation2 + $0xa28] sm:$0xff]  ;;  %v188_v4 = vld [vmem:[#allocation2 + $0x278] sm:$0xff] }
  0xae   :  { %837 = vmatprep.subr.mxu1 %v120_v5  ;;  %700 = vmatpush1.msra.mxu0 %v365_v6  ;;  %v433_v5 = vld [vmem:[#allocation2 + $0xa20] sm:$0xff]  ;;  %v187_v6 = vld [vmem:[#allocation2 + $0x270] sm:$0xff] }
  0xaf   :  { %838 = vmatpush1.msra.mxu1 %v119_v7  ;;  %701 = vmatprep.subr.mxu0 %v490_v8  ;;  %v430_v7 = vld [vmem:[#allocation2 + $0xa08] sm:$0xff]  ;;  %v184_v8 = vld [vmem:[#allocation2 + $0x258] sm:$0xff] }
  0xb0   :  { %839 = vmatprep.subr.mxu1 %v116_v9  ;;  %702 = vmatpush2.msra.mxu0 %v489_v10  ;;  %v429_v9 = vld [vmem:[#allocation2 + $0xa00] sm:$0xff]  ;;  %v2195_v10 = vld [vmem:[%s2264_s0 + $0x28] sm:$0xff] }
  0xb1   :  { %840 = vmatpush1.msra.mxu1 %v115_v11  ;;  %703 = vmatprep.subr.mxu0 %v486_v12  ;;  %v183_v11 = vld [vmem:[#allocation2 + $0x250] sm:$0xff]  ;;  %v2200_v12 = vld [vmem:[%s2264_s0 + $0x20] sm:$0xff] }
  0xb2   :  { %841 = vmatprep.subr.mxu1 %v112_v13  ;;  %704 = vmatpush2.msra.mxu0 %v485_v14  ;;  %v180_v13 = vld [vmem:[#allocation2 + $0x238] sm:$0xff] }
  0xb3   :  { %842 = vmatpush1.msra.mxu1 %v111_v15  ;;  %705 = vmatprep.subr.mxu0 %v482_v16  ;;  %v300_v14 = vld [vmem:[#allocation2 + $0x5f8] sm:$0xff]  ;;  %v179_v15 = vld [vmem:[#allocation2 + $0x230] sm:$0xff] }
  0xb4   :  { %843 = vmatprep.subr.mxu1 %v236_v18  ;;  %706 = vmatpush2.msra.mxu0 %v481_v19  ;;  %v299_v16 = vld [vmem:[#allocation2 + $0x5f0] sm:$0xff]  ;;  %v176_v18 = vld [vmem:[#allocation2 + $0x218] sm:$0xff] }
  0xb5   :  { %844 = vmatpush2.msra.mxu1 %v235_v20  ;;  %707 = vmatprep.subr.mxu0 %v478_v21  ;;  %v296_v19 = vld [vmem:[#allocation2 + $0x5d8] sm:$0xff]  ;;  %v175_v20 = vld [vmem:[#allocation2 + $0x210] sm:$0xff] }
  0xb6   :  { %845 = vmatprep.subr.mxu1 %v232_v22  ;;  %708 = vmatpush2.msra.mxu0 %v477_v23  ;;  %v295_v21 = vld [vmem:[#allocation2 + $0x5d0] sm:$0xff]  ;;  %v292_v22 = vld [vmem:[#allocation2 + $0x5b8] sm:$0xff] }
  0xb7   :  { %846 = vmatpush2.msra.mxu1 %v231_v24  ;;  %709 = vmatprep.subr.mxu0 %v474_v25  ;;  %v428_v23 = vld [vmem:[#allocation2 + $0x9f8] sm:$0xff]  ;;  %v291_v24 = vld [vmem:[#allocation2 + $0x5b0] sm:$0xff] }
  0xb8   :  { %847 = vmatprep.subr.mxu1 %v228_v26  ;;  %710 = vmatpush2.msra.mxu0 %v473_v27  ;;  %v427_v25 = vld [vmem:[#allocation2 + $0x9f0] sm:$0xff]  ;;  %v288_v26 = vld [vmem:[#allocation2 + $0x598] sm:$0xff] }
  0xb9   :  { %848 = vmatpush2.msra.mxu1 %v227_v28  ;;  %711 = vmatprep.subr.mxu0 %v470_v29  ;;  %v424_v27 = vld [vmem:[#allocation2 + $0x9d8] sm:$0xff]  ;;  %v287_v28 = vld [vmem:[#allocation2 + $0x590] sm:$0xff] }
  0xba   :  { %849 = vmatprep.subr.mxu1 %v224_v30  ;;  %712 = vmatpush2.msra.mxu0 %v469_v31  ;;  %v423_v29 = vld [vmem:[#allocation2 + $0x9d0] sm:$0xff]  ;;  %v284_v30 = vld [vmem:[#allocation2 + $0x578] sm:$0xff] }
  0xbb   :  { %850 = vmatpush2.msra.mxu1 %v223_v32  ;;  %713 = vmatprep.subr.mxu0 %v466_v33  ;;  %v420_v31 = vld [vmem:[#allocation2 + $0x9b8] sm:$0xff]  ;;  %v283_v32 = vld [vmem:[#allocation2 + $0x570] sm:$0xff] }
  0xbc   :  { %851 = vmatprep.subr.mxu1 %v220_v34  ;;  %714 = vmatpush2.msra.mxu0 %v465_v35  ;;  %v419_v33 = vld [vmem:[#allocation2 + $0x9b0] sm:$0xff]  ;;  %v416_v34 = vld [vmem:[#allocation2 + $0x998] sm:$0xff] }
  0xbd   :  { %852 = vmatpush2.msra.mxu1 %v219_v36  ;;  %715 = vmatprep.subr.mxu0 %v462_v37  ;;  %v415_v35 = vld [vmem:[#allocation2 + $0x990] sm:$0xff]  ;;  %v276_v36 = vld [vmem:[#allocation2 + $0x538] sm:$0xff] }
  0xbe   :  { %853 = vmatprep.subr.mxu1 %v216_v38  ;;  %716 = vmatpush2.msra.mxu0 %v461_v39  ;;  %v412_v37 = vld [vmem:[#allocation2 + $0x978] sm:$0xff]  ;;  %v275_v38 = vld [vmem:[#allocation2 + $0x530] sm:$0xff] }
  0xbf   :  { %854 = vmatpush2.msra.mxu1 %v215_v40  ;;  %717 = vmatprep.subr.mxu0 %v458_v41  ;;  %v411_v39 = vld [vmem:[#allocation2 + $0x970] sm:$0xff]  ;;  %v272_v40 = vld [vmem:[#allocation2 + $0x518] sm:$0xff] }
  0xc0   :  { %855 = vmatprep.subr.mxu1 %v212_v42  ;;  %718 = vmatpush2.msra.mxu0 %v457_v43  ;;  %v408_v41 = vld [vmem:[#allocation2 + $0x958] sm:$0xff]  ;;  %v271_v42 = vld [vmem:[#allocation2 + $0x510] sm:$0xff] }
  0xc1   :  { %856 = vmatpush2.msra.mxu1 %v211_v44  ;;  %719 = vmatprep.subr.mxu0 %v454_v45  ;;  %v407_v43 = vld [vmem:[#allocation2 + $0x950] sm:$0xff]  ;;  %v268_v44 = vld [vmem:[#allocation2 + $0x4f8] sm:$0xff] }
  0xc2   :  { %857 = vmatprep.subr.mxu1 %v208_v46  ;;  %720 = vmatpush2.msra.mxu0 %v453_v47  ;;  %v404_v45 = vld [vmem:[#allocation2 + $0x938] sm:$0xff]  ;;  %v267_v46 = vld [vmem:[#allocation2 + $0x4f0] sm:$0xff] }
  0xc3   :  { %858 = vmatpush2.msra.mxu1 %v207_v48  ;;  %721 = vmatprep.subr.mxu0 %v450_v49  ;;  %v403_v47 = vld [vmem:[#allocation2 + $0x930] sm:$0xff]  ;;  %v264_v48 = vld [vmem:[#allocation2 + $0x4d8] sm:$0xff] }
  0xc4   :  { %859 = vmatprep.subr.mxu1 %v204_v50  ;;  %722 = vmatpush2.msra.mxu0 %v449_v51  ;;  %v400_v49 = vld [vmem:[#allocation2 + $0x918] sm:$0xff]  ;;  %v263_v50 = vld [vmem:[#allocation2 + $0x4d0] sm:$0xff] }
  0xc5   :  { %860 = vmatpush2.msra.mxu1 %v203_v52  ;;  %723 = vmatprep.subr.mxu0 %v446_v53  ;;  %v399_v51 = vld [vmem:[#allocation2 + $0x910] sm:$0xff]  ;;  %v260_v52 = vld [vmem:[#allocation2 + $0x4b8] sm:$0xff] }
  0xc6   :  { %861 = vmatprep.subr.mxu1 %v200_v54  ;;  %724 = vmatpush2.msra.mxu0 %v445_v55  ;;  %v396_v53 = vld [vmem:[#allocation2 + $0x8f8] sm:$0xff]  ;;  %v259_v54 = vld [vmem:[#allocation2 + $0x4b0] sm:$0xff] }
  0xc7   :  { %862 = vmatpush2.msra.mxu1 %v199_v56  ;;  %725 = vmatprep.subr.mxu0 %v442_v57  ;;  %v395_v55 = vld [vmem:[#allocation2 + $0x8f0] sm:$0xff]  ;;  %v256_v56 = vld [vmem:[#allocation2 + $0x498] sm:$0xff] }
  0xc8   :  { %863 = vmatprep.subr.mxu1 %v196_v58  ;;  %726 = vmatpush2.msra.mxu0 %v441_v59  ;;  %v392_v57 = vld [vmem:[#allocation2 + $0x8d8] sm:$0xff]  ;;  %v255_v58 = vld [vmem:[#allocation2 + $0x490] sm:$0xff] }
  0xc9   :  { %864 = vmatpush2.msra.mxu1 %v195_v60  ;;  %727 = vmatprep.subr.mxu0 %v438_v61  ;;  %v391_v59 = vld [vmem:[#allocation2 + $0x8d0] sm:$0xff]  ;;  %v252_v60 = vld [vmem:[#allocation2 + $0x478] sm:$0xff] }
  0xca   :  { %865 = vmatprep.subr.mxu1 %v192_v62  ;;  %728 = vmatpush2.msra.mxu0 %v437_v0  ;;  %v388_v61 = vld [vmem:[#allocation2 + $0x8b8] sm:$0xff]  ;;  %v251_v62 = vld [vmem:[#allocation2 + $0x470] sm:$0xff] }
  0xcb   :  { %866 = vmatpush2.msra.mxu1 %v191_v1  ;;  %729 = vmatprep.subr.mxu0 %v434_v3  ;;  %v387_v0 = vld [vmem:[#allocation2 + $0x8b0] sm:$0xff]  ;;  %v248_v1 = vld [vmem:[#allocation2 + $0x458] sm:$0xff] }
  0xcc   :  { %867 = vmatprep.subr.mxu1 %v188_v4  ;;  %730 = vmatpush2.msra.mxu0 %v433_v5  ;;  %v384_v3 = vld [vmem:[#allocation2 + $0x898] sm:$0xff]  ;;  %v247_v4 = vld [vmem:[#allocation2 + $0x450] sm:$0xff] }
  0xcd   :  { %868 = vmatpush2.msra.mxu1 %v187_v6  ;;  %731 = vmatprep.subr.mxu0 %v430_v7  ;;  %v383_v5 = vld [vmem:[#allocation2 + $0x890] sm:$0xff]  ;;  %v244_v6 = vld [vmem:[#allocation2 + $0x438] sm:$0xff] }
  0xce   :  { %869 = vmatprep.subr.mxu1 %v184_v8  ;;  %732 = vmatpush2.msra.mxu0 %v429_v9  ;;  %v380_v7 = vld [vmem:[#allocation2 + $0x878] sm:$0xff]  ;;  %v243_v8 = vld [vmem:[#allocation2 + $0x430] sm:$0xff] }
  0xcf   :  { %733 = vmatprep.mubr.f32.mxu0 %v2195_v10  ;;  %870 = vmatpush2.msra.mxu1 %v183_v11  ;;  %v379_v9 = vld [vmem:[#allocation2 + $0x870] sm:$0xff]  ;;  %v240_v11 = vld [vmem:[#allocation2 + $0x418] sm:$0xff] }
  0xd0   :  { %734 = vmatmul.mubr.f32.vlgmr.msra.gmra.mxu0 %v2200_v12  ;;  %871 = vmatprep.subr.mxu1 %v180_v13  ;;  %v376_v13 = vld [vmem:[#allocation2 + $0x858] sm:$0xff] }
  0xd1   :  { %882 = vmatprep.subr.mxu0 %v300_v14  ;;  %872 = vmatpush2.msra.mxu1 %v179_v15  ;;  %v239_v14 = vld [vmem:[#allocation2 + $0x410] sm:$0xff] }
  0xd2   :  { %883 = vmatpush1.msra.mxu0 %v299_v16  ;;  %873 = vmatprep.subr.mxu1 %v176_v18  ;;  %v375_v15 = vld [vmem:[#allocation2 + $0x850] sm:$0xff]  ;;  %v364_v16 = vld [vmem:[#allocation2 + $0x7f8] sm:$0xff] }
  0xd3   :  { %884 = vmatprep.subr.mxu0 %v296_v19  ;;  %874 = vmatpush2.msra.mxu1 %v175_v20  ;;  %v372_v18 = vld [vmem:[#allocation2 + $0x838] sm:$0xff]  ;;  %v363_v19 = vld [vmem:[#allocation2 + $0x7f0] sm:$0xff] }
  0xd4   :  { %875 = vmatprep.mubr.f32.mxu1 %v2172_v63  ;;  %885 = vmatpush1.msra.mxu0 %v295_v21  ;;  %v280_v63 = vld [vmem:[#allocation2 + $0x558] sm:$0xff]  ;;  %v371_v20 = vld [vmem:[#allocation2 + $0x830] sm:$0xff] }
  0xd5   :  { %876 = vmatmul.mubr.f32.vlgmr.msra.gmra.mxu1 %v2180_v2  ;;  %886 = vmatprep.subr.mxu0 %v292_v22  ;;  %v279_v2 = vld [vmem:[#allocation2 + $0x550] sm:$0xff]  ;;  %v360_v21 = vld [vmem:[#allocation2 + $0x7d8] sm:$0xff] }
  0xd6   :  { %953 = vmatprep.subr.mxu1 %v428_v23  ;;  %887 = vmatpush1.msra.mxu0 %v291_v24  ;;  %v368_v22 = vld [vmem:[#allocation2 + $0x818] sm:$0xff]  ;;  %v359_v23 = vld [vmem:[#allocation2 + $0x7d0] sm:$0xff] }
  0xd7   :  { %954 = vmatpush1.msra.mxu1 %v427_v25  ;;  %888 = vmatprep.subr.mxu0 %v288_v26  ;;  %v367_v24 = vld [vmem:[#allocation2 + $0x810] sm:$0xff]  ;;  %v356_v25 = vld [vmem:[#allocation2 + $0x7b8] sm:$0xff] }
  0xd8   :  { %955 = vmatprep.subr.mxu1 %v424_v27  ;;  %889 = vmatpush1.msra.mxu0 %v287_v28  ;;  %v492_v26 = vld [vmem:[#allocation2 + $0xbf8] sm:$0xff]  ;;  %v355_v27 = vld [vmem:[#allocation2 + $0x7b0] sm:$0xff] }
  0xd9   :  { %956 = vmatpush1.msra.mxu1 %v423_v29  ;;  %890 = vmatprep.subr.mxu0 %v284_v30  ;;  %v491_v28 = vld [vmem:[#allocation2 + $0xbf0] sm:$0xff]  ;;  %v352_v29 = vld [vmem:[#allocation2 + $0x798] sm:$0xff] }
  0xda   :  { %957 = vmatprep.subr.mxu1 %v420_v31  ;;  %891 = vmatpush1.msra.mxu0 %v283_v32  ;;  %v488_v30 = vld [vmem:[#allocation2 + $0xbd8] sm:$0xff]  ;;  %v351_v31 = vld [vmem:[#allocation2 + $0x790] sm:$0xff] }
  0xdb   :  { %958 = vmatpush1.msra.mxu1 %v419_v33  ;;  %892 = vmatprep.subr.mxu0 %v280_v63  ;;  %v487_v32 = vld [vmem:[#allocation2 + $0xbd0] sm:$0xff]  ;;  %v348_v33 = vld [vmem:[#allocation2 + $0x778] sm:$0xff] }
  0xdc   :  { %959 = vmatprep.subr.mxu1 %v416_v34  ;;  %893 = vmatpush1.msra.mxu0 %v279_v2  ;;  %v484_v63 = vld [vmem:[#allocation2 + $0xbb8] sm:$0xff]  ;;  %v347_v34 = vld [vmem:[#allocation2 + $0x770] sm:$0xff] }
  0xdd   :  { %960 = vmatpush1.msra.mxu1 %v415_v35  ;;  %894 = vmatprep.subr.mxu0 %v276_v36  ;;  %v483_v2 = vld [vmem:[#allocation2 + $0xbb0] sm:$0xff]  ;;  %v344_v35 = vld [vmem:[#allocation2 + $0x758] sm:$0xff] }
  0xde   :  { %961 = vmatprep.subr.mxu1 %v412_v37  ;;  %895 = vmatpush1.msra.mxu0 %v275_v38  ;;  %v480_v36 = vld [vmem:[#allocation2 + $0xb98] sm:$0xff]  ;;  %v343_v37 = vld [vmem:[#allocation2 + $0x750] sm:$0xff] }
  0xdf   :  { %962 = vmatpush1.msra.mxu1 %v411_v39  ;;  %896 = vmatprep.subr.mxu0 %v272_v40  ;;  %v479_v38 = vld [vmem:[#allocation2 + $0xb90] sm:$0xff]  ;;  %v340_v39 = vld [vmem:[#allocation2 + $0x738] sm:$0xff] }
  0xe0   :  { %963 = vmatprep.subr.mxu1 %v408_v41  ;;  %897 = vmatpush1.msra.mxu0 %v271_v42  ;;  %v476_v40 = vld [vmem:[#allocation2 + $0xb78] sm:$0xff]  ;;  %v339_v41 = vld [vmem:[#allocation2 + $0x730] sm:$0xff] }
  0xe1   :  { %964 = vmatpush1.msra.mxu1 %v407_v43  ;;  %898 = vmatprep.subr.mxu0 %v268_v44  ;;  %v475_v42 = vld [vmem:[#allocation2 + $0xb70] sm:$0xff]  ;;  %v336_v43 = vld [vmem:[#allocation2 + $0x718] sm:$0xff] }
  0xe2   :  { %965 = vmatprep.subr.mxu1 %v404_v45  ;;  %899 = vmatpush1.msra.mxu0 %v267_v46  ;;  %v472_v44 = vld [vmem:[#allocation2 + $0xb58] sm:$0xff]  ;;  %v335_v45 = vld [vmem:[#allocation2 + $0x710] sm:$0xff] }
  0xe3   :  { %966 = vmatpush1.msra.mxu1 %v403_v47  ;;  %900 = vmatprep.subr.mxu0 %v264_v48  ;;  %v471_v46 = vld [vmem:[#allocation2 + $0xb50] sm:$0xff]  ;;  %v332_v47 = vld [vmem:[#allocation2 + $0x6f8] sm:$0xff] }
  0xe4   :  { %967 = vmatprep.subr.mxu1 %v400_v49  ;;  %901 = vmatpush1.msra.mxu0 %v263_v50  ;;  %v468_v48 = vld [vmem:[#allocation2 + $0xb38] sm:$0xff]  ;;  %v331_v49 = vld [vmem:[#allocation2 + $0x6f0] sm:$0xff] }
  0xe5   :  { %968 = vmatpush1.msra.mxu1 %v399_v51  ;;  %902 = vmatprep.subr.mxu0 %v260_v52  ;;  %v467_v50 = vld [vmem:[#allocation2 + $0xb30] sm:$0xff]  ;;  %v328_v51 = vld [vmem:[#allocation2 + $0x6d8] sm:$0xff] }
  0xe6   :  { %969 = vmatprep.subr.mxu1 %v396_v53  ;;  %903 = vmatpush1.msra.mxu0 %v259_v54  ;;  %v464_v52 = vld [vmem:[#allocation2 + $0xb18] sm:$0xff]  ;;  %v327_v53 = vld [vmem:[#allocation2 + $0x6d0] sm:$0xff] }
  0xe7   :  { %970 = vmatpush1.msra.mxu1 %v395_v55  ;;  %904 = vmatprep.subr.mxu0 %v256_v56  ;;  %v463_v54 = vld [vmem:[#allocation2 + $0xb10] sm:$0xff]  ;;  %v324_v55 = vld [vmem:[#allocation2 + $0x6b8] sm:$0xff] }
  0xe8   :  { %971 = vmatprep.subr.mxu1 %v392_v57  ;;  %905 = vmatpush1.msra.mxu0 %v255_v58  ;;  %v460_v56 = vld [vmem:[#allocation2 + $0xaf8] sm:$0xff]  ;;  %v323_v57 = vld [vmem:[#allocation2 + $0x6b0] sm:$0xff] }
  0xe9   :  { %972 = vmatpush1.msra.mxu1 %v391_v59  ;;  %906 = vmatprep.subr.mxu0 %v252_v60  ;;  %v459_v58 = vld [vmem:[#allocation2 + $0xaf0] sm:$0xff]  ;;  %v320_v59 = vld [vmem:[#allocation2 + $0x698] sm:$0xff] }
  0xea   :  { %973 = vmatprep.subr.mxu1 %v388_v61  ;;  %907 = vmatpush1.msra.mxu0 %v251_v62  ;;  %v456_v60 = vld [vmem:[#allocation2 + $0xad8] sm:$0xff]  ;;  %v319_v61 = vld [vmem:[#allocation2 + $0x690] sm:$0xff] }
  0xeb   :  { %974 = vmatpush1.msra.mxu1 %v387_v0  ;;  %908 = vmatprep.subr.mxu0 %v248_v1  ;;  %v455_v62 = vld [vmem:[#allocation2 + $0xad0] sm:$0xff]  ;;  %v316_v0 = vld [vmem:[#allocation2 + $0x678] sm:$0xff] }
  0xec   :  { %975 = vmatprep.subr.mxu1 %v384_v3  ;;  %909 = vmatpush1.msra.mxu0 %v247_v4  ;;  %v452_v1 = vld [vmem:[#allocation2 + $0xab8] sm:$0xff]  ;;  %v315_v3 = vld [vmem:[#allocation2 + $0x670] sm:$0xff] }
  0xed   :  { %976 = vmatpush1.msra.mxu1 %v383_v5  ;;  %910 = vmatprep.subr.mxu0 %v244_v6  ;;  %v451_v4 = vld [vmem:[#allocation2 + $0xab0] sm:$0xff]  ;;  %v312_v5 = vld [vmem:[#allocation2 + $0x658] sm:$0xff] }
  0xee   :  { %977 = vmatprep.subr.mxu1 %v380_v7  ;;  %911 = vmatpush1.msra.mxu0 %v243_v8  ;;  %v448_v6 = vld [vmem:[#allocation2 + $0xa98] sm:$0xff]  ;;  %v311_v7 = vld [vmem:[#allocation2 + $0x650] sm:$0xff] }
  0xef   :  { %978 = vmatpush1.msra.mxu1 %v379_v9  ;;  %912 = vmatprep.subr.mxu0 %v240_v11  ;;  %v447_v8 = vld [vmem:[#allocation2 + $0xa90] sm:$0xff]  ;;  %v308_v9 = vld [vmem:[#allocation2 + $0x638] sm:$0xff] }
  0xf0   :  { %979 = vmatprep.subr.mxu1 %v376_v13  ;;  %913 = vmatpush1.msra.mxu0 %v239_v14  ;;  %v444_v11 = vld [vmem:[#allocation2 + $0xa78] sm:$0xff]  ;;  %v307_v13 = vld [vmem:[#allocation2 + $0x630] sm:$0xff] }
  0xf1   :  { %980 = vmatpush1.msra.mxu1 %v375_v15  ;;  %914 = vmatprep.subr.mxu0 %v364_v16  ;;  %v443_v14 = vld [vmem:[#allocation2 + $0xa70] sm:$0xff]  ;;  %v304_v15 = vld [vmem:[#allocation2 + $0x618] sm:$0xff] }
  0xf2   :  { %981 = vmatprep.subr.mxu1 %v372_v18  ;;  %915 = vmatpush2.msra.mxu0 %v363_v19  ;;  %v440_v16 = vld [vmem:[#allocation2 + $0xa58] sm:$0xff]  ;;  %v303_v18 = vld [vmem:[#allocation2 + $0x610] sm:$0xff] }
  0xf3   :  { %982 = vmatpush1.msra.mxu1 %v371_v20  ;;  %916 = vmatprep.subr.mxu0 %v360_v21  ;;  %v439_v19 = vld [vmem:[#allocation2 + $0xa50] sm:$0xff]  ;;  %v436_v20 = vld [vmem:[#allocation2 + $0xa38] sm:$0xff] }
  0xf4   :  { %983 = vmatprep.subr.mxu1 %v368_v22  ;;  %917 = vmatpush2.msra.mxu0 %v359_v23  ;;  %v500_v21 = vld [vmem:[#allocation2 + $0xc38] sm:$0xff]  ;;  %v435_v23 = vld [vmem:[#allocation2 + $0xa30] sm:$0xff] }
  0xf5   :  { %984 = vmatpush1.msra.mxu1 %v367_v24  ;;  %918 = vmatprep.subr.mxu0 %v356_v25  ;;  %v1969_v22 = vld [vmem:[%s2264_s0 + $0x18] sm:$0xff]  ;;  %v499_v24 = vld [vmem:[#allocation2 + $0xc30] sm:$0xff] }
  0xf6   :  { %985 = vmatprep.subr.mxu1 %v492_v26  ;;  %919 = vmatpush2.msra.mxu0 %v355_v27  ;;  %v1970_v25 = vld [vmem:[%s2264_s0 + $0x10] sm:$0xff]  ;;  %v432_v26 = vld [vmem:[#allocation2 + $0xa18] sm:$0xff] }
  0xf7   :  { %986 = vmatpush2.msra.mxu1 %v491_v28  ;;  %920 = vmatprep.subr.mxu0 %v352_v29  ;;  %v496_v27 = vld [vmem:[#allocation2 + $0xc18] sm:$0xff]  ;;  %v431_v28 = vld [vmem:[#allocation2 + $0xa10] sm:$0xff] }
  0xf8   :  { %987 = vmatprep.subr.mxu1 %v488_v30  ;;  %921 = vmatpush2.msra.mxu0 %v351_v31  ;;  %v495_v29 = vld [vmem:[#allocation2 + $0xc10] sm:$0xff]  ;;  %v1159_v31 = vld [vmem:[#allocation6 + $0x1e0] sm:$0xff] }
  0xf9   :  { %988 = vmatpush2.msra.mxu1 %v487_v32  ;;  %922 = vmatprep.subr.mxu0 %v348_v33  ;;  %v1160_v30 = vld [vmem:[#allocation6 + $0x1e8] sm:$0xff] }
  0xfa   :  { %989 = vmatprep.subr.mxu1 %v484_v63  ;;  %923 = vmatpush2.msra.mxu0 %v347_v34  ;;  %v1971_v32 = vld [vmem:[%s2264_s0 + $0x30] sm:$0xff]  ;;  %v1155_v63 = vld [vmem:[#allocation6 + $0x1c0] sm:$0xff] }
  0xfb   :  { %990 = vmatpush2.msra.mxu1 %v483_v2  ;;  %924 = vmatprep.subr.mxu0 %v344_v35  ;;  %v1156_v33 = vld [vmem:[#allocation6 + $0x1c8] sm:$0xff] }
  0xfc   :  { %991 = vmatprep.subr.mxu1 %v480_v36  ;;  %925 = vmatpush2.msra.mxu0 %v343_v37  ;;  %v1152_v34 = vld [vmem:[#allocation6 + $0x1a8] sm:$0xff]  ;;  %v1287_v36 = vld [vmem:[#allocation6 + $0x5e0] sm:$0xff] }
  0xfd   :  { %992 = vmatpush2.msra.mxu1 %v479_v38  ;;  %926 = vmatprep.subr.mxu0 %v340_v39  ;;  %v1148_v2 = vld [vmem:[#allocation6 + $0x188] sm:$0xff]  ;;  %v1143_v37 = vld [vmem:[#allocation6 + $0x160] sm:$0xff] }
  0xfe   :  { %993 = vmatprep.subr.mxu1 %v476_v40  ;;  %927 = vmatpush2.msra.mxu0 %v339_v41  ;;  %v1288_v35 = vld [vmem:[#allocation6 + $0x5e8] sm:$0xff]  ;;  %v1283_v40 = vld [vmem:[#allocation6 + $0x5c0] sm:$0xff] }
  0xff   :  { %994 = vmatpush2.msra.mxu1 %v475_v42  ;;  %928 = vmatprep.subr.mxu0 %v336_v43  ;;  %v1284_v38 = vld [vmem:[#allocation6 + $0x5c8] sm:$0xff]  ;;  %v1139_v41 = vld [vmem:[#allocation6 + $0x140] sm:$0xff] }
 0x100   :  { %995 = vmatprep.subr.mxu1 %v472_v44  ;;  %929 = vmatpush2.msra.mxu0 %v335_v45  ;;  %v1140_v39 = vld [vmem:[#allocation6 + $0x148] sm:$0xff]  ;;  %v1279_v44 = vld [vmem:[#allocation6 + $0x5a0] sm:$0xff] }
 0x101   :  { %996 = vmatpush2.msra.mxu1 %v471_v46  ;;  %930 = vmatprep.subr.mxu0 %v332_v47  ;;  %v1280_v42 = vld [vmem:[#allocation6 + $0x5a8] sm:$0xff]  ;;  %v1135_v45 = vld [vmem:[#allocation6 + $0x120] sm:$0xff] }
 0x102   :  { %997 = vmatprep.subr.mxu1 %v468_v48  ;;  %931 = vmatpush2.msra.mxu0 %v331_v49  ;;  %v1136_v43 = vld [vmem:[#allocation6 + $0x128] sm:$0xff]  ;;  %v1275_v48 = vld [vmem:[#allocation6 + $0x580] sm:$0xff] }
 0x103   :  { %998 = vmatpush2.msra.mxu1 %v467_v50  ;;  %932 = vmatprep.subr.mxu0 %v328_v51  ;;  %v1276_v46 = vld [vmem:[#allocation6 + $0x588] sm:$0xff]  ;;  %v1131_v49 = vld [vmem:[#allocation6 + $0x100] sm:$0xff] }
 0x104   :  { %999 = vmatprep.subr.mxu1 %v464_v52  ;;  %933 = vmatpush2.msra.mxu0 %v327_v53  ;;  %v1132_v47 = vld [vmem:[#allocation6 + $0x108] sm:$0xff]  ;;  %v1271_v52 = vld [vmem:[#allocation6 + $0x560] sm:$0xff] }
 0x105   :  { %1000 = vmatpush2.msra.mxu1 %v463_v54  ;;  %934 = vmatprep.subr.mxu0 %v324_v55  ;;  %v1272_v50 = vld [vmem:[#allocation6 + $0x568] sm:$0xff]  ;;  %v1127_v53 = vld [vmem:[#allocation6 + $0xe0] sm:$0xff] }
 0x106   :  { %1001 = vmatprep.subr.mxu1 %v460_v56  ;;  %935 = vmatpush2.msra.mxu0 %v323_v57  ;;  %v1128_v51 = vld [vmem:[#allocation6 + $0xe8] sm:$0xff]  ;;  %v1267_v56 = vld [vmem:[#allocation6 + $0x540] sm:$0xff] }
 0x107   :  { %1002 = vmatpush2.msra.mxu1 %v459_v58  ;;  %936 = vmatprep.subr.mxu0 %v320_v59  ;;  %v1268_v54 = vld [vmem:[#allocation6 + $0x548] sm:$0xff]  ;;  %v1123_v57 = vld [vmem:[#allocation6 + $0xc0] sm:$0xff] }
 0x108   :  { %1003 = vmatprep.subr.mxu1 %v456_v60  ;;  %937 = vmatpush2.msra.mxu0 %v319_v61  ;;  %v1124_v55 = vld [vmem:[#allocation6 + $0xc8] sm:$0xff]  ;;  %v1263_v60 = vld [vmem:[#allocation6 + $0x520] sm:$0xff] }
 0x109   :  { %1004 = vmatpush2.msra.mxu1 %v455_v62  ;;  %938 = vmatprep.subr.mxu0 %v316_v0  ;;  %v1264_v58 = vld [vmem:[#allocation6 + $0x528] sm:$0xff]  ;;  %v1119_v61 = vld [vmem:[#allocation6 + $0xa0] sm:$0xff] }
 0x10a   :  { %1005 = vmatprep.subr.mxu1 %v452_v1  ;;  %939 = vmatpush2.msra.mxu0 %v315_v3  ;;  %v1120_v59 = vld [vmem:[#allocation6 + $0xa8] sm:$0xff]  ;;  %v1259_v1 = vld [vmem:[#allocation6 + $0x500] sm:$0xff] }
 0x10b   :  { %1006 = vmatpush2.msra.mxu1 %v451_v4  ;;  %940 = vmatprep.subr.mxu0 %v312_v5  ;;  %v1260_v62 = vld [vmem:[#allocation6 + $0x508] sm:$0xff]  ;;  %v1115_v3 = vld [vmem:[#allocation6 + $0x80] sm:$0xff] }
 0x10c   :  { %1007 = vmatprep.subr.mxu1 %v448_v6  ;;  %941 = vmatpush2.msra.mxu0 %v311_v7  ;;  %v1116_v0 = vld [vmem:[#allocation6 + $0x88] sm:$0xff]  ;;  %v1255_v6 = vld [vmem:[#allocation6 + $0x4e0] sm:$0xff] }
 0x10d   :  { %1008 = vmatpush2.msra.mxu1 %v447_v8  ;;  %942 = vmatprep.subr.mxu0 %v308_v9  ;;  %v1256_v4 = vld [vmem:[#allocation6 + $0x4e8] sm:$0xff]  ;;  %v1111_v7 = vld [vmem:[#allocation6 + $0x60] sm:$0xff] }
 0x10e   :  { %1009 = vmatprep.subr.mxu1 %v444_v11  ;;  %943 = vmatpush2.msra.mxu0 %v307_v13  ;;  %v1112_v5 = vld [vmem:[#allocation6 + $0x68] sm:$0xff]  ;;  %v1251_v11 = vld [vmem:[#allocation6 + $0x4c0] sm:$0xff] }
 0x10f   :  { %1010 = vmatpush2.msra.mxu1 %v443_v14  ;;  %944 = vmatprep.subr.mxu0 %v304_v15  ;;  %v1252_v8 = vld [vmem:[#allocation6 + $0x4c8] sm:$0xff]  ;;  %v1107_v13 = vld [vmem:[#allocation6 + $0x40] sm:$0xff] }
 0x110   :  { %1011 = vmatprep.subr.mxu1 %v440_v16  ;;  %945 = vmatpush2.msra.mxu0 %v303_v18  ;;  %v1108_v9 = vld [vmem:[#allocation6 + $0x48] sm:$0xff]  ;;  %v1247_v16 = vld [vmem:[#allocation6 + $0x4a0] sm:$0xff] }
 0x111   :  { %946 = vmatprep.mubr.f32.mxu0 %v1969_v22  ;;  %1012 = vmatpush2.msra.mxu1 %v439_v19  ;;  %v1248_v14 = vld [vmem:[#allocation6 + $0x4a8] sm:$0xff]  ;;  %v1103_v18 = vld [vmem:[#allocation6 + $0x20] sm:$0xff] }
 0x112   :  { %947 = vmatmul.mubr.f32.vlgmr.msra.gmra.mxu0 %v1970_v25  ;;  %1013 = vmatprep.subr.mxu1 %v436_v20  ;;  %v1104_v15 = vld [vmem:[#allocation6 + $0x28] sm:$0xff]  ;;  %v1099_v22 = vld [vmem:[#allocation6] sm:$0xff] }
 0x113   :  { %1052 = vmatprep.subr.mxu0 %v500_v21  ;;  %1014 = vmatpush2.msra.mxu1 %v435_v23  ;;  %v1244_v19 = vld [vmem:[#allocation6 + $0x488] sm:$0xff]  ;;  %v1243_v21 = vld [vmem:[#allocation6 + $0x480] sm:$0xff] }
 0x114   :  { %1053 = vmatpush1.msra.mxu0 %v499_v24  ;;  %1015 = vmatprep.subr.mxu1 %v432_v26  ;;  %v1100_v20 = vld [vmem:[#allocation6 + $0x8] sm:$0xff]  ;;  %v1239_v25 = vld [vmem:[#allocation6 + $0x460] sm:$0xff] }
 0x115   :  { %1054 = vmatprep.subr.mxu0 %v496_v27  ;;  %1016 = vmatpush2.msra.mxu1 %v431_v28  ;;  %v1240_v23 = vld [vmem:[#allocation6 + $0x468] sm:$0xff]  ;;  %v1223_v26 = vld [vmem:[#allocation6 + $0x3e0] sm:$0xff] }
 0x116   :  { %1017 = vmatprep.mubr.f32.mxu1 %v2195_v10  ;;  %1055 = vmatpush1.msra.mxu0 %v495_v29  ;;  %v1151_v10 = vld [vmem:[#allocation6 + $0x1a0] sm:$0xff]  ;;  %v1224_v24 = vld [vmem:[#allocation6 + $0x3e8] sm:$0xff] }
 0x117   :  { %1088 = vmatprep.mubr.f32.mxu0 %v2110_v17  ;;  %1018 = vmatmul.mubr.f32.vlgmr.msra.gmra.mxu1 %v2200_v12  ;;  %v1147_v17 = vld [vmem:[#allocation6 + $0x180] sm:$0xff]  ;;  %v1144_v12 = vld [vmem:[#allocation6 + $0x168] sm:$0xff] }
 0x118   :  { %1886 = vmatmul.mubr.msk.f32.vlgmr.msra.gmra.mxu0 %vm523_vm0, %v1971_v32  ;;  %1377 = vmatprep.subr.mxu0 %v1160_v30  ;;  %v1236_v27 = vld [vmem:[#allocation6 + $0x448] sm:$0xff]  ;;  %v1235_v29 = vld [vmem:[#allocation6 + $0x440] sm:$0xff] }
 0x119   :  { %1378 = vmatpush1.msra.mxu0 %v1159_v31  ;;  %1448 = vmatprep.subr.mxu1 %v1288_v35  ;;  %v1220_v28 = vld [vmem:[#allocation6 + $0x3c8] sm:$0xff]  ;;  %v1219_v30 = vld [vmem:[#allocation6 + $0x3c0] sm:$0xff] }
 0x11a   :  { %1379 = vmatprep.subr.mxu0 %v1156_v33  ;;  %1449 = vmatpush1.msra.mxu1 %v1287_v36  ;;  %v1232_v31 = vld [vmem:[#allocation6 + $0x428] sm:$0xff]  ;;  %v1231_v33 = vld [vmem:[#allocation6 + $0x420] sm:$0xff] }
 0x11b   :  { %1380 = vmatpush1.msra.mxu0 %v1155_v63  ;;  %1450 = vmatprep.subr.mxu1 %v1284_v38  ;;  %v1216_v32 = vld [vmem:[#allocation6 + $0x3a8] sm:$0xff]  ;;  %v1215_v63 = vld [vmem:[#allocation6 + $0x3a0] sm:$0xff] }
 0x11c   :  { %1381 = vmatprep.subr.mxu0 %v1152_v34  ;;  %1451 = vmatpush1.msra.mxu1 %v1283_v40  ;;  %v1228_v34 = vld [vmem:[#allocation6 + $0x408] sm:$0xff]  ;;  %v1351_v36 = vld [vmem:[#allocation6 + $0x7e0] sm:$0xff] }
 0x11d   :  { %1382 = vmatpush1.msra.mxu0 %v1151_v10  ;;  %1452 = vmatprep.subr.mxu1 %v1280_v42  ;;  %v1212_v10 = vld [vmem:[#allocation6 + $0x388] sm:$0xff]  ;;  %v1347_v40 = vld [vmem:[#allocation6 + $0x7c0] sm:$0xff] }
 0x11e   :  { %1383 = vmatprep.subr.mxu0 %v1148_v2  ;;  %1453 = vmatpush1.msra.mxu1 %v1279_v44  ;;  %v1227_v2 = vld [vmem:[#allocation6 + $0x400] sm:$0xff]  ;;  %v1352_v35 = vld [vmem:[#allocation6 + $0x7e8] sm:$0xff] }
 0x11f   :  { %1384 = vmatpush1.msra.mxu0 %v1147_v17  ;;  %1454 = vmatprep.subr.mxu1 %v1276_v46  ;;  %v1211_v17 = vld [vmem:[#allocation6 + $0x380] sm:$0xff]  ;;  %v1348_v38 = vld [vmem:[#allocation6 + $0x7c8] sm:$0xff] }
 0x120   :  { %1385 = vmatprep.subr.mxu0 %v1144_v12  ;;  %1455 = vmatpush1.msra.mxu1 %v1275_v48  ;;  %v1208_v12 = vld [vmem:[#allocation6 + $0x368] sm:$0xff]  ;;  %v1343_v44 = vld [vmem:[#allocation6 + $0x7a0] sm:$0xff] }
 0x121   :  { %1386 = vmatpush1.msra.mxu0 %v1143_v37  ;;  %1456 = vmatprep.subr.mxu1 %v1272_v50  ;;  %v1207_v37 = vld [vmem:[#allocation6 + $0x360] sm:$0xff]  ;;  %v1344_v42 = vld [vmem:[#allocation6 + $0x7a8] sm:$0xff] }
 0x122   :  { %1387 = vmatprep.subr.mxu0 %v1140_v39  ;;  %1457 = vmatpush1.msra.mxu1 %v1271_v52  ;;  %v1204_v39 = vld [vmem:[#allocation6 + $0x348] sm:$0xff]  ;;  %v1339_v48 = vld [vmem:[#allocation6 + $0x780] sm:$0xff] }
 0x123   :  { %1388 = vmatpush1.msra.mxu0 %v1139_v41  ;;  %1458 = vmatprep.subr.mxu1 %v1268_v54  ;;  %v1203_v41 = vld [vmem:[#allocation6 + $0x340] sm:$0xff]  ;;  %v1340_v46 = vld [vmem:[#allocation6 + $0x788] sm:$0xff] }
 0x124   :  { %1389 = vmatprep.subr.mxu0 %v1136_v43  ;;  %1459 = vmatpush1.msra.mxu1 %v1267_v56  ;;  %v1200_v43 = vld [vmem:[#allocation6 + $0x328] sm:$0xff]  ;;  %v1335_v52 = vld [vmem:[#allocation6 + $0x760] sm:$0xff] }
 0x125   :  { %1390 = vmatpush1.msra.mxu0 %v1135_v45  ;;  %1460 = vmatprep.subr.mxu1 %v1264_v58  ;;  %v1199_v45 = vld [vmem:[#allocation6 + $0x320] sm:$0xff]  ;;  %v1336_v50 = vld [vmem:[#allocation6 + $0x768] sm:$0xff] }
 0x126   :  { %1391 = vmatprep.subr.mxu0 %v1132_v47  ;;  %1461 = vmatpush1.msra.mxu1 %v1263_v60  ;;  %v1196_v47 = vld [vmem:[#allocation6 + $0x308] sm:$0xff]  ;;  %v1331_v56 = vld [vmem:[#allocation6 + $0x740] sm:$0xff] }
 0x127   :  { %1392 = vmatpush1.msra.mxu0 %v1131_v49  ;;  %1462 = vmatprep.subr.mxu1 %v1260_v62  ;;  %v1195_v49 = vld [vmem:[#allocation6 + $0x300] sm:$0xff]  ;;  %v1332_v54 = vld [vmem:[#allocation6 + $0x748] sm:$0xff] }
 0x128   :  { %1393 = vmatprep.subr.mxu0 %v1128_v51  ;;  %1463 = vmatpush1.msra.mxu1 %v1259_v1  ;;  %v1192_v51 = vld [vmem:[#allocation6 + $0x2e8] sm:$0xff]  ;;  %v1327_v60 = vld [vmem:[#allocation6 + $0x720] sm:$0xff] }
 0x129   :  { %1394 = vmatpush1.msra.mxu0 %v1127_v53  ;;  %1464 = vmatprep.subr.mxu1 %v1256_v4  ;;  %v1191_v53 = vld [vmem:[#allocation6 + $0x2e0] sm:$0xff]  ;;  %v1328_v58 = vld [vmem:[#allocation6 + $0x728] sm:$0xff] }
 0x12a   :  { %1395 = vmatprep.subr.mxu0 %v1124_v55  ;;  %1465 = vmatpush1.msra.mxu1 %v1255_v6  ;;  %v1188_v55 = vld [vmem:[#allocation6 + $0x2c8] sm:$0xff]  ;;  %v1323_v1 = vld [vmem:[#allocation6 + $0x700] sm:$0xff] }
 0x12b   :  { %1396 = vmatpush1.msra.mxu0 %v1123_v57  ;;  %1466 = vmatprep.subr.mxu1 %v1252_v8  ;;  %v1187_v57 = vld [vmem:[#allocation6 + $0x2c0] sm:$0xff]  ;;  %v1324_v62 = vld [vmem:[#allocation6 + $0x708] sm:$0xff] }
 0x12c   :  { %1397 = vmatprep.subr.mxu0 %v1120_v59  ;;  %1467 = vmatpush1.msra.mxu1 %v1251_v11  ;;  %v1184_v59 = vld [vmem:[#allocation6 + $0x2a8] sm:$0xff]  ;;  %v1319_v6 = vld [vmem:[#allocation6 + $0x6e0] sm:$0xff] }
 0x12d   :  { %1398 = vmatpush1.msra.mxu0 %v1119_v61  ;;  %1468 = vmatprep.subr.mxu1 %v1248_v14  ;;  %v1183_v61 = vld [vmem:[#allocation6 + $0x2a0] sm:$0xff]  ;;  %v1320_v4 = vld [vmem:[#allocation6 + $0x6e8] sm:$0xff] }
 0x12e   :  { %1399 = vmatprep.subr.mxu0 %v1116_v0  ;;  %1469 = vmatpush1.msra.mxu1 %v1247_v16  ;;  %v1180_v0 = vld [vmem:[#allocation6 + $0x288] sm:$0xff]  ;;  %v1171_v11 = vld [vmem:[#allocation6 + $0x240] sm:$0xff] }
 0x12f   :  { %1400 = vmatpush1.msra.mxu0 %v1115_v3  ;;  %1470 = vmatprep.subr.mxu1 %v1244_v19  ;;  %v1179_v3 = vld [vmem:[#allocation6 + $0x280] sm:$0xff]  ;;  %v1316_v8 = vld [vmem:[#allocation6 + $0x6c8] sm:$0xff] }
 0x130   :  { %1401 = vmatprep.subr.mxu0 %v1112_v5  ;;  %1471 = vmatpush1.msra.mxu1 %v1243_v21  ;;  %v1176_v5 = vld [vmem:[#allocation6 + $0x268] sm:$0xff]  ;;  %v1167_v14 = vld [vmem:[#allocation6 + $0x220] sm:$0xff] }
 0x131   :  { %1402 = vmatpush1.msra.mxu0 %v1111_v7  ;;  %1472 = vmatprep.subr.mxu1 %v1240_v23  ;;  %v1175_v7 = vld [vmem:[#allocation6 + $0x260] sm:$0xff]  ;;  %v1312_v16 = vld [vmem:[#allocation6 + $0x6a8] sm:$0xff] }
 0x132   :  { %1403 = vmatprep.subr.mxu0 %v1108_v9  ;;  %1473 = vmatpush1.msra.mxu1 %v1239_v25  ;;  %v1172_v9 = vld [vmem:[#allocation6 + $0x248] sm:$0xff]  ;;  %v1163_v19 = vld [vmem:[#allocation6 + $0x200] sm:$0xff] }
 0x133   :  { %1404 = vmatpush1.msra.mxu0 %v1107_v13  ;;  %1474 = vmatprep.subr.mxu1 %v1236_v27  ;;  %v1168_v13 = vld [vmem:[#allocation6 + $0x228] sm:$0xff]  ;;  %v1307_v23 = vld [vmem:[#allocation6 + $0x680] sm:$0xff] }
 0x134   :  { %1405 = vmatprep.subr.mxu0 %v1104_v15  ;;  %1475 = vmatpush1.msra.mxu1 %v1235_v29  ;;  %v1315_v15 = vld [vmem:[#allocation6 + $0x6c0] sm:$0xff]  ;;  %v1308_v21 = vld [vmem:[#allocation6 + $0x688] sm:$0xff] }
 0x135   :  { %1406 = vmatpush1.msra.mxu0 %v1103_v18  ;;  %1476 = vmatprep.subr.mxu1 %v1232_v31  ;;  %v1164_v18 = vld [vmem:[#allocation6 + $0x208] sm:$0xff]  ;;  %v1303_v25 = vld [vmem:[#allocation6 + $0x660] sm:$0xff] }
 0x136   :  { %1407 = vmatprep.subr.mxu0 %v1100_v20  ;;  %1477 = vmatpush1.msra.mxu1 %v1231_v33  ;;  %v1311_v20 = vld [vmem:[#allocation6 + $0x6a0] sm:$0xff]  ;;  %v503_v33 = vlaneseq }
 0x137   :  { %1408 = vmatpush1.msra.mxu0 %v1099_v22  ;;  %1478 = vmatprep.subr.mxu1 %v1228_v34  ;;  %v1162_v22 = vld [vmem:[#allocation6 + $0x1f8] sm:$0xff]  ;;  %v1299_v27 = vld [vmem:[#allocation6 + $0x640] sm:$0xff] }
 0x138   :  { %1409 = vmatprep.subr.mxu0 %v1224_v24  ;;  %1479 = vmatpush1.msra.mxu1 %v1227_v2  ;;  %v1304_v24 = vld [vmem:[#allocation6 + $0x668] sm:$0xff]  ;;  %v1295_v29 = vld [vmem:[#allocation6 + $0x620] sm:$0xff] }
 0x139   :  { %1410 = vmatpush2.msra.mxu0 %v1223_v26  ;;  %1480 = vmatprep.subr.mxu1 %v1352_v35  ;;  %v1300_v26 = vld [vmem:[#allocation6 + $0x648] sm:$0xff]  ;;  %v1291_v31 = vld [vmem:[#allocation6 + $0x600] sm:$0xff] }
 0x13a   :  { %1411 = vmatprep.subr.mxu0 %v1220_v28  ;;  %1481 = vmatpush2.msra.mxu1 %v1351_v36  ;;  %v1296_v28 = vld [vmem:[#allocation6 + $0x628] sm:$0xff] }
 0x13b   :  { %1412 = vmatpush2.msra.mxu0 %v1219_v30  ;;  %1482 = vmatprep.subr.mxu1 %v1348_v38  ;;  %v1292_v30 = vld [vmem:[#allocation6 + $0x608] sm:$0xff] }
 0x13c   :  { %1413 = vmatprep.subr.mxu0 %v1216_v32  ;;  %1483 = vmatpush2.msra.mxu1 %v1347_v40  ;;  %v1290_v32 = vld [vmem:[#allocation6 + $0x5f8] sm:$0xff] }
 0x13d   :  { %1414 = vmatpush2.msra.mxu0 %v1215_v63  ;;  %1484 = vmatprep.subr.mxu1 %v1344_v42  ;;  %v2219_v63 = vshrl.u32 %v503_v33, 7  ;;  %v1210_v33 = vld [vmem:[#allocation6 + $0x378] sm:$0xff] }
 0x13e   :  { %1415 = vmatprep.subr.mxu0 %v1212_v10  ;;  %1485 = vmatpush2.msra.mxu1 %v1343_v44  ;;  %v2222_v10 = vld [vmem:[#allocation4] sm:$0xf] }
 0x13f   :  { %1416 = vmatpush2.msra.mxu0 %v1211_v17  ;;  %1486 = vmatprep.subr.mxu1 %v1340_v46  ;;  %v505_v34 = vsub.s32 0, %v2219_v63  ;;  %v509_v2 = vsub.s32 1, %v2219_v63 }
 0x140   :  { %1417 = vmatprep.subr.mxu0 %v1208_v12  ;;  %1487 = vmatpush2.msra.mxu1 %v1339_v48 }
 0x141   :  { %1418 = vmatpush2.msra.mxu0 %v1207_v37  ;;  %1488 = vmatprep.subr.mxu1 %v1336_v50  ;;  %v506_v35 = vrot.slane %v2222_v10, %v505_v34  ;;  %v510_v36 = vrot.slane %v2222_v10, %v509_v2 }
 0x142   :  { %1419 = vmatprep.subr.mxu0 %v1204_v39  ;;  %1489 = vmatpush2.msra.mxu1 %v1335_v52 }
 0x143   :  { %1420 = vmatpush2.msra.mxu0 %v1203_v41  ;;  %1490 = vmatprep.subr.mxu1 %v1332_v54  ;;  %v1158_v54 = vld [vmem:[#allocation6 + $0x1d8] sm:$0xff] }
 0x144   :  { %1421 = vmatprep.subr.mxu0 %v1200_v43  ;;  %1491 = vmatpush2.msra.mxu1 %v1331_v56  ;;  %v1154_v56 = vld [vmem:[#allocation6 + $0x1b8] sm:$0xff] }
 0x145   :  { %1422 = vmatpush2.msra.mxu0 %v1199_v45  ;;  %1492 = vmatprep.subr.mxu1 %v1328_v58  ;;  %v1150_v58 = vld [vmem:[#allocation6 + $0x198] sm:$0xff] }
 0x146   :  { %1423 = vmatprep.subr.mxu0 %v1196_v47  ;;  %1493 = vmatpush2.msra.mxu1 %v1327_v60  ;;  %v1146_v60 = vld [vmem:[#allocation6 + $0x178] sm:$0xff] }
 0x147   :  { %1424 = vmatpush2.msra.mxu0 %v1195_v49  ;;  %1494 = vmatprep.subr.mxu1 %v1324_v62  ;;  %v1142_v62 = vld [vmem:[#allocation6 + $0x158] sm:$0xff] }
 0x148   :  { %1425 = vmatprep.subr.mxu0 %v1192_v51  ;;  %1495 = vmatpush2.msra.mxu1 %v1323_v1  ;;  %v1138_v1 = vld [vmem:[#allocation6 + $0x138] sm:$0xff] }
 0x149   :  { %1426 = vmatpush2.msra.mxu0 %v1191_v53  ;;  %1496 = vmatprep.subr.mxu1 %v1320_v4  ;;  %v1161_v53 = vld [vmem:[#allocation6 + $0x1f0] sm:$0xff]  ;;  %v1134_v4 = vld [vmem:[#allocation6 + $0x118] sm:$0xff] }
 0x14a   :  { %1427 = vmatprep.subr.mxu0 %v1188_v55  ;;  %1497 = vmatpush2.msra.mxu1 %v1319_v6  ;;  %v1157_v55 = vld [vmem:[#allocation6 + $0x1d0] sm:$0xff]  ;;  %v1130_v6 = vld [vmem:[#allocation6 + $0xf8] sm:$0xff] }
 0x14b   :  { %1428 = vmatpush2.msra.mxu0 %v1187_v57  ;;  %1498 = vmatprep.subr.mxu1 %v1316_v8  ;;  %v1153_v57 = vld [vmem:[#allocation6 + $0x1b0] sm:$0xff]  ;;  %v1126_v8 = vld [vmem:[#allocation6 + $0xd8] sm:$0xff] }
 0x14c   :  { %1429 = vmatprep.subr.mxu0 %v1184_v59  ;;  %1499 = vmatpush2.msra.mxu1 %v1315_v15  ;;  %v1149_v59 = vld [vmem:[#allocation6 + $0x190] sm:$0xff] }
 0x14d   :  { %1430 = vmatpush2.msra.mxu0 %v1183_v61  ;;  %1500 = vmatprep.subr.mxu1 %v1312_v16  ;;  %v593_v17 = vpop.f32.mrf.mxu0  ;;  %v1145_v61 = vld [vmem:[#allocation6 + $0x170] sm:$0xff]  ;;  %v1114_v16 = vld [vmem:[#allocation6 + $0x78] sm:$0xff] }
 0x14e   :  { %1431 = vmatprep.subr.mxu0 %v1180_v0  ;;  %1501 = vmatpush2.msra.mxu1 %v1311_v20  ;;  %v664_v12 = vpop.f32.mrf.mxu1  ;;  %v594_v38 = vadd.f32 %v593_v17, %v506_v35  ;;  %v1141_v0 = vld [vmem:[#allocation6 + $0x150] sm:$0xff]  ;;  %v1206_v35 = vld [vmem:[#allocation6 + $0x358] sm:$0xff] }
 0x14f   :  { %1432 = vmatpush2.msra.mxu0 %v1179_v3  ;;  %1502 = vmatprep.subr.mxu1 %v1308_v21  ;;  %v595_v37 = vpop.f32.mrf.mxu0  ;;  %v1137_v3 = vld [vmem:[#allocation6 + $0x130] sm:$0xff]  ;;  %v1106_v21 = vld [vmem:[#allocation6 + $0x38] sm:$0xff] }
 0x150   :  { %1433 = vmatprep.subr.mxu0 %v1176_v5  ;;  %1503 = vmatpush2.msra.mxu1 %v1307_v23  ;;  %v666_v39 = vpop.f32.mrf.mxu1  ;;  %v596_v40 = vadd.f32 %v595_v37, %v510_v36  ;;  %v665_v41 = vadd.f32 %v664_v12, %v594_v38  ;;  %v1133_v5 = vld [vmem:[#allocation6 + $0x110] sm:$0xff]  ;;  %v1102_v23 = vld [vmem:[#allocation6 + $0x18] sm:$0xff] }
 0x151   :  { %1434 = vmatpush2.msra.mxu0 %v1175_v7  ;;  %1504 = vmatprep.subr.mxu1 %v1304_v24  ;;  %v1129_v7 = vld [vmem:[#allocation6 + $0xf0] sm:$0xff]  ;;  %v1202_v36 = vld [vmem:[#allocation6 + $0x338] sm:$0xff] }
 0x152   :  { %1435 = vmatprep.subr.mxu0 %v1172_v9  ;;  %1505 = vmatpush2.msra.mxu1 %v1303_v25  ;;  %v667_v44 = vadd.f32 %v666_v39, %v596_v40  ;;  %v1125_v9 = vld [vmem:[#allocation6 + $0xd0] sm:$0xff]  ;;  %v1226_v25 = vld [vmem:[#allocation6 + $0x3f8] sm:$0xff] }
 0x153   :  { %1436 = vmatpush2.msra.mxu0 %v1171_v11  ;;  %1506 = vmatprep.subr.mxu1 %v1300_v26  ;;  %v806_v42 = vpop.f32.mrf.mxu1  ;;  %v1122_v11 = vld [vmem:[#allocation6 + $0xb8] sm:$0xff]  ;;  %v1117_v15 = vld [vmem:[#allocation6 + $0x90] sm:$0xff] }
 0x154   :  { %1437 = vmatprep.subr.mxu0 %v1168_v13  ;;  %1507 = vmatpush2.msra.mxu1 %v1299_v27  ;;  %v1121_v13 = vld [vmem:[#allocation6 + $0xb0] sm:$0xff]  ;;  %v1222_v27 = vld [vmem:[#allocation6 + $0x3d8] sm:$0xff] }
 0x155   :  { %1438 = vmatpush2.msra.mxu0 %v1167_v14  ;;  %1508 = vmatprep.subr.mxu1 %v1296_v28  ;;  %v808_v48 = vpop.f32.mrf.mxu1  ;;  %v1118_v14 = vld [vmem:[#allocation6 + $0x98] sm:$0xff]  ;;  %v1109_v20 = vld [vmem:[#allocation6 + $0x50] sm:$0xff] }
 0x156   :  { %1439 = vmatprep.subr.mxu0 %v1164_v18  ;;  %1509 = vmatpush2.msra.mxu1 %v1295_v29  ;;  %v1113_v18 = vld [vmem:[#allocation6 + $0x70] sm:$0xff]  ;;  %v1218_v29 = vld [vmem:[#allocation6 + $0x3b8] sm:$0xff] }
 0x157   :  { %1440 = vmatpush2.msra.mxu0 %v1163_v19  ;;  %1510 = vmatprep.subr.mxu1 %v1292_v30  ;;  %v1110_v19 = vld [vmem:[#allocation6 + $0x58] sm:$0xff]  ;;  %v1101_v24 = vld [vmem:[#allocation6 + $0x10] sm:$0xff] }
 0x158   :  { %1519 = vmatprep.subr.mxu0 %v1162_v22  ;;  %1511 = vmatpush2.msra.mxu1 %v1291_v31  ;;  %v1105_v22 = vld [vmem:[#allocation6 + $0x30] sm:$0xff]  ;;  %v1214_v31 = vld [vmem:[#allocation6 + $0x398] sm:$0xff] }
 0x159   :  { %1590 = vmatprep.subr.mxu1 %v1290_v32  ;;  %v1225_v26 = vld [vmem:[#allocation6 + $0x3f0] sm:$0xff]  ;;  %v1198_v38 = vld [vmem:[#allocation6 + $0x318] sm:$0xff] }
 0x15a   :  { %v1221_v28 = vld [vmem:[#allocation6 + $0x3d0] sm:$0xff]  ;;  %v1194_v40 = vld [vmem:[#allocation6 + $0x2f8] sm:$0xff] }
 0x15b   :  { %v1217_v30 = vld [vmem:[#allocation6 + $0x3b0] sm:$0xff] }
 0x15c   :  { %v1213_v32 = vld [vmem:[#allocation6 + $0x390] sm:$0xff] }
 0x15d   :  { %v1209_v17 = vld [vmem:[#allocation6 + $0x370] sm:$0xff] }
 0x15e   :  { %v1205_v12 = vld [vmem:[#allocation6 + $0x350] sm:$0xff] }
 0x15f   :  { %v1201_v37 = vld [vmem:[#allocation6 + $0x330] sm:$0xff] }
 0x160   :  { %v1197_v39 = vld [vmem:[#allocation6 + $0x310] sm:$0xff] }
 0x190   :  { %v735_v43 = vpop.f32.mrf.mxu0 }
 0x191   :  { %v736_v45 = vadd.f32 %v735_v43, %v665_v41  ;;  %v1193_v41 = vld [vmem:[#allocation6 + $0x2f0] sm:$0xff] }
 0x192   :  { %v737_v46 = vpop.f32.mrf.mxu0  ;;  %v1189_v43 = vld [vmem:[#allocation6 + $0x2d0] sm:$0xff] }
 0x193   :  { %v738_v47 = vadd.f32 %v737_v46, %v667_v44  ;;  %v2231_v49 = vadd.f32 %v806_v42, %v736_v45  ;;  %v1190_v42 = vld [vmem:[#allocation6 + $0x2d8] sm:$0xff]  ;;  %v1185_v45 = vld [vmem:[#allocation6 + $0x2b0] sm:$0xff]  ;;  %v513_v46 = vsub.s32 2, %v2219_v63 }
 0x194   :  { %v1186_v44 = vld [vmem:[#allocation6 + $0x2b8] sm:$0xff] }
 0x195   :  { %v809_v50 = vadd.f32 %v808_v48, %v738_v47  ;;  %v1095_v52 = vmax.f32 %v2231_v49, 0.0  ;;  %v1182_v47 = vld [vmem:[#allocation6 + $0x298] sm:$0xff]  ;;  %v1181_v48 = vld [vmem:[#allocation6 + $0x290] sm:$0xff] }
 0x196   :  { %v1286_v49 = vld [vmem:[#allocation6 + $0x5d8] sm:$0xff] }
 0x197   :  { %v1096_v51 = vmax.f32 %v809_v50, 0.0  ;;  %v517_v50 = vsub.s32 3, %v2219_v63 }
 0x199   :  { %1441 = vmatprep.mubr.f32.mxu0 %v1096_v51 }
 0x19a   :  { %1442 = vmatmul.mubr.f32.vlgmr.msra.gmra.mxu0 %v1095_v52 }
 0x19b   :  { %1520 = vmatpush1.msra.mxu0 %v1161_v53  ;;  %1583 = vmatprep.mubr.f32.mxu0 %v1096_v51  ;;  %v1178_v51 = vld [vmem:[#allocation6 + $0x278] sm:$0xff]  ;;  %v877_v53 = vpop.f32.mrf.mxu1 }
 0x19c   :  { %1521 = vmatprep.subr.mxu0 %v1158_v54  ;;  %v1177_v54 = vld [vmem:[#allocation6 + $0x270] sm:$0xff] }
 0x19d   :  { %1522 = vmatpush1.msra.mxu0 %v1157_v55  ;;  %v514_v55 = vrot.slane %v2222_v10, %v513_v46 }
 0x19e   :  { %1523 = vmatprep.subr.mxu0 %v1154_v56  ;;  %v1174_v56 = vld [vmem:[#allocation6 + $0x258] sm:$0xff] }
 0x19f   :  { %1524 = vmatpush1.msra.mxu0 %v1153_v57 }
 0x1a0   :  { %1525 = vmatprep.subr.mxu0 %v1150_v58  ;;  %v1173_v58 = vld [vmem:[#allocation6 + $0x250] sm:$0xff] }
 0x1a1   :  { %1526 = vmatpush1.msra.mxu0 %v1149_v59  ;;  %v518_v59 = vrot.slane %v2222_v10, %v517_v50 }
 0x1a2   :  { %1527 = vmatprep.subr.mxu0 %v1146_v60  ;;  %v1170_v60 = vld [vmem:[#allocation6 + $0x238] sm:$0xff] }
 0x1a3   :  { %1528 = vmatpush1.msra.mxu0 %v1145_v61  ;;  %v879_v61 = vpop.f32.mrf.mxu1 }
 0x1a4   :  { %1529 = vmatprep.subr.mxu0 %v1142_v62 }
 0x1a5   :  { %1530 = vmatpush1.msra.mxu0 %v1141_v0  ;;  %v1169_v0 = vld [vmem:[#allocation6 + $0x230] sm:$0xff] }
 0x1a6   :  { %1531 = vmatprep.subr.mxu0 %v1138_v1  ;;  %v878_v1 = vadd.f32 %v877_v53, %v514_v55  ;;  %v1261_v53 = vld [vmem:[#allocation6 + $0x510] sm:$0xff]  ;;  %v1258_v55 = vld [vmem:[#allocation6 + $0x4f8] sm:$0xff] }
 0x1a7   :  { %1532 = vmatpush1.msra.mxu0 %v1137_v3  ;;  %v1166_v3 = vld [vmem:[#allocation6 + $0x218] sm:$0xff] }
 0x1a8   :  { %1533 = vmatprep.subr.mxu0 %v1134_v4  ;;  %v1165_v4 = vld [vmem:[#allocation6 + $0x210] sm:$0xff] }
 0x1a9   :  { %1534 = vmatpush1.msra.mxu0 %v1133_v5  ;;  %v880_v5 = vadd.f32 %v879_v61, %v518_v59  ;;  %v1250_v59 = vld [vmem:[#allocation6 + $0x4b8] sm:$0xff] }
 0x1aa   :  { %1535 = vmatprep.subr.mxu0 %v1130_v6  ;;  %v1246_v61 = vld [vmem:[#allocation6 + $0x498] sm:$0xff] }
 0x1ab   :  { %1536 = vmatpush1.msra.mxu0 %v1129_v7 }
 0x1ac   :  { %1537 = vmatprep.subr.mxu0 %v1126_v8 }
 0x1ad   :  { %1538 = vmatpush1.msra.mxu0 %v1125_v9 }
 0x1ae   :  { %1539 = vmatprep.subr.mxu0 %v1122_v11 }
 0x1af   :  { %1540 = vmatpush1.msra.mxu0 %v1121_v13 }
 0x1b0   :  { %1541 = vmatprep.subr.mxu0 %v1118_v14 }
 0x1b1   :  { %1542 = vmatpush1.msra.mxu0 %v1117_v15 }
 0x1b2   :  { %1543 = vmatprep.subr.mxu0 %v1114_v16 }
 0x1b3   :  { %1544 = vmatpush1.msra.mxu0 %v1113_v18  ;;  %v1696_v18 = vld [vmem:[#allocation9 + $0xf8] sm:$0xff] }
 0x1b4   :  { %1545 = vmatprep.subr.mxu0 %v1110_v19  ;;  %v1680_v19 = vld [vmem:[#allocation9 + $0x78] sm:$0xff] }
 0x1b5   :  { %1546 = vmatpush1.msra.mxu0 %v1109_v20  ;;  %v1695_v20 = vld [vmem:[#allocation9 + $0xf0] sm:$0xff] }
 0x1b6   :  { %1547 = vmatprep.subr.mxu0 %v1106_v21  ;;  %v1679_v21 = vld [vmem:[#allocation9 + $0x70] sm:$0xff] }
 0x1b7   :  { %1548 = vmatpush1.msra.mxu0 %v1105_v22 }
 0x1b8   :  { %1549 = vmatprep.subr.mxu0 %v1102_v23  ;;  %v1694_v23 = vld [vmem:[#allocation9 + $0xe8] sm:$0xff] }
 0x1b9   :  { %1550 = vmatpush1.msra.mxu0 %v1101_v24 }
 0x1ba   :  { %1551 = vmatprep.subr.mxu0 %v1226_v25  ;;  %v1289_v25 = vld [vmem:[#allocation6 + $0x5f0] sm:$0xff] }
 0x1bb   :  { %1552 = vmatpush2.msra.mxu0 %v1225_v26  ;;  %v1285_v26 = vld [vmem:[#allocation6 + $0x5d0] sm:$0xff] }
 0x1bc   :  { %1553 = vmatprep.subr.mxu0 %v1222_v27  ;;  %v1693_v27 = vld [vmem:[#allocation9 + $0xe0] sm:$0xff] }
 0x1bd   :  { %1554 = vmatpush2.msra.mxu0 %v1221_v28  ;;  %v1282_v28 = vld [vmem:[#allocation6 + $0x5b8] sm:$0xff] }
 0x1be   :  { %1555 = vmatprep.subr.mxu0 %v1218_v29  ;;  %v1677_v29 = vld [vmem:[#allocation9 + $0x60] sm:$0xff] }
 0x1bf   :  { %1556 = vmatpush2.msra.mxu0 %v1217_v30  ;;  %v1281_v30 = vld [vmem:[#allocation6 + $0x5b0] sm:$0xff] }
 0x1c0   :  { %1557 = vmatprep.subr.mxu0 %v1214_v31  ;;  %v1692_v31 = vld [vmem:[#allocation9 + $0xd8] sm:$0xff] }
 0x1c1   :  { %1558 = vmatpush2.msra.mxu0 %v1213_v32  ;;  %v1278_v32 = vld [vmem:[#allocation6 + $0x598] sm:$0xff] }
 0x1c2   :  { %1559 = vmatprep.subr.mxu0 %v1210_v33  ;;  %v1676_v33 = vld [vmem:[#allocation9 + $0x58] sm:$0xff] }
 0x1c3   :  { %1560 = vmatpush2.msra.mxu0 %v1209_v17  ;;  %v1277_v17 = vld [vmem:[#allocation6 + $0x590] sm:$0xff] }
 0x1c4   :  { %1561 = vmatprep.subr.mxu0 %v1206_v35  ;;  %v1691_v35 = vld [vmem:[#allocation9 + $0xd0] sm:$0xff] }
 0x1c5   :  { %1562 = vmatpush2.msra.mxu0 %v1205_v12  ;;  %v1274_v12 = vld [vmem:[#allocation6 + $0x578] sm:$0xff] }
 0x1c6   :  { %1563 = vmatprep.subr.mxu0 %v1202_v36  ;;  %v1675_v36 = vld [vmem:[#allocation9 + $0x50] sm:$0xff] }
 0x1c7   :  { %1564 = vmatpush2.msra.mxu0 %v1201_v37  ;;  %v1273_v37 = vld [vmem:[#allocation6 + $0x570] sm:$0xff] }
 0x1c8   :  { %1565 = vmatprep.subr.mxu0 %v1198_v38  ;;  %v1690_v38 = vld [vmem:[#allocation9 + $0xc8] sm:$0xff] }
 0x1c9   :  { %1566 = vmatpush2.msra.mxu0 %v1197_v39  ;;  %v1270_v39 = vld [vmem:[#allocation6 + $0x558] sm:$0xff] }
 0x1ca   :  { %1567 = vmatprep.subr.mxu0 %v1194_v40  ;;  %v1674_v40 = vld [vmem:[#allocation9 + $0x48] sm:$0xff] }
 0x1cb   :  { %1568 = vmatpush2.msra.mxu0 %v1193_v41  ;;  %v1269_v41 = vld [vmem:[#allocation6 + $0x550] sm:$0xff] }
 0x1cc   :  { %1569 = vmatprep.subr.mxu0 %v1190_v42  ;;  %v1689_v42 = vld [vmem:[#allocation9 + $0xc0] sm:$0xff] }
 0x1cd   :  { %1570 = vmatpush2.msra.mxu0 %v1189_v43  ;;  %v1266_v43 = vld [vmem:[#allocation6 + $0x538] sm:$0xff] }
 0x1ce   :  { %1571 = vmatprep.subr.mxu0 %v1186_v44  ;;  %v1673_v44 = vld [vmem:[#allocation9 + $0x40] sm:$0xff] }
 0x1cf   :  { %1572 = vmatpush2.msra.mxu0 %v1185_v45  ;;  %v1265_v45 = vld [vmem:[#allocation6 + $0x530] sm:$0xff] }
 0x1d0   :  { %1573 = vmatprep.subr.mxu0 %v1182_v47  ;;  %v1688_v47 = vld [vmem:[#allocation9 + $0xb8] sm:$0xff] }
 0x1d1   :  { %1574 = vmatpush2.msra.mxu0 %v1181_v48  ;;  %v1262_v48 = vld [vmem:[#allocation6 + $0x518] sm:$0xff] }
 0x1d2   :  { %v948_v57 = vpop.f32.mrf.mxu0  ;;  %1575 = vmatprep.subr.mxu0 %v1178_v51  ;;  %v1672_v51 = vld [vmem:[#allocation9 + $0x38] sm:$0xff] }
 0x1d3   :  { %1576 = vmatpush2.msra.mxu0 %v1177_v54  ;;  %v949_v6 = vadd.f32 %v948_v57, %v878_v1  ;;  %v1687_v54 = vld [vmem:[#allocation9 + $0xb0] sm:$0xff] }
 0x1d4   :  { %v950_v62 = vpop.f32.mrf.mxu0  ;;  %1577 = vmatprep.subr.mxu0 %v1174_v56  ;;  %v1257_v56 = vld [vmem:[#allocation6 + $0x4f0] sm:$0xff]  ;;  %v1254_v57 = vld [vmem:[#allocation6 + $0x4d8] sm:$0xff] }
 0x1d5   :  { %1578 = vmatpush2.msra.mxu0 %v1173_v58  ;;  %v951_v9 = vadd.f32 %v950_v62, %v880_v5  ;;  %v1253_v58 = vld [vmem:[#allocation6 + $0x4d0] sm:$0xff]  ;;  %v1234_v5 = vld [vmem:[#allocation6 + $0x438] sm:$0xff] }
 0x1d6   :  { %1579 = vmatprep.subr.mxu0 %v1170_v60  ;;  %v1249_v60 = vld [vmem:[#allocation6 + $0x4b0] sm:$0xff] }
 0x1d7   :  { %1580 = vmatpush2.msra.mxu0 %v1169_v0  ;;  %v1019_v7 = vpop.f32.mrf.mxu1  ;;  %v1245_v62 = vld [vmem:[#allocation6 + $0x490] sm:$0xff]  ;;  %v1242_v0 = vld [vmem:[#allocation6 + $0x478] sm:$0xff] }
 0x1d8   :  { %v1090_v8 = vpop.f32.mrf.mxu0  ;;  %1581 = vmatprep.subr.mxu0 %v1166_v3  ;;  %v1020_v11 = vadd.f32 %v1019_v7, %v949_v6  ;;  %v1241_v1 = vld [vmem:[#allocation6 + $0x470] sm:$0xff]  ;;  %v1238_v3 = vld [vmem:[#allocation6 + $0x458] sm:$0xff] }
 0x1d9   :  { %1582 = vmatpush2.msra.mxu0 %v1165_v4  ;;  %v1021_v10 = vpop.f32.mrf.mxu1  ;;  %v1237_v4 = vld [vmem:[#allocation6 + $0x450] sm:$0xff]  ;;  %v1230_v7 = vld [vmem:[#allocation6 + $0x418] sm:$0xff] }
 0x1da   :  { %1584 = vmatmul.mubr.f32.vlgmr.msra.gmra.mxu0 %v1095_v52  ;;  %v1022_v13 = vadd.f32 %v1021_v10, %v951_v9  ;;  %v2246_v14 = vadd.f32 %v1090_v8, %v1020_v11  ;;  %v1092_v15 = vpop.f32.mrf.mxu0  ;;  %1888 = vmatprep.subr.mxu0 %v1696_v18  ;;  %v1678_v52 = vld [vmem:[#allocation9 + $0x68] sm:$0xff]  ;;  %v1354_v9 = vld [vmem:[#allocation6 + $0x7f8] sm:$0xff] }
 0x1db   :  { %1889 = vmatpush3.msra.mxu0 %v1680_v19  ;;  %v1233_v6 = vld [vmem:[#allocation6 + $0x430] sm:$0xff]  ;;  %v1350_v10 = vld [vmem:[#allocation6 + $0x7d8] sm:$0xff] }
 0x1dc   :  { %v1093_v16 = vadd.f32 %v1092_v15, %v1022_v13  ;;  %v1097_v24 = vmax.f32 %v2246_v14, 0.0  ;;  %1890 = vmatprep.subr.mxu0 %v1695_v20  ;;  %v1229_v8 = vld [vmem:[#allocation6 + $0x410] sm:$0xff]  ;;  %v1346_v15 = vld [vmem:[#allocation6 + $0x7b8] sm:$0xff] }
 0x1dd   :  { %1891 = vmatpush3.msra.mxu0 %v1679_v21  ;;  %v1353_v11 = vld [vmem:[#allocation6 + $0x7f0] sm:$0xff]  ;;  %v1342_v18 = vld [vmem:[#allocation6 + $0x798] sm:$0xff] }
 0x1de   :  { %v1098_v22 = vmax.f32 %v1093_v16, 0.0  ;;  %1892 = vmatprep.subr.mxu0 %v1694_v23  ;;  %v1349_v13 = vld [vmem:[#allocation6 + $0x7d0] sm:$0xff]  ;;  %v1338_v20 = vld [vmem:[#allocation6 + $0x778] sm:$0xff] }
 0x1df   :  { %1893 = vmatpush3.msra.mxu0 %v1678_v52  ;;  %v1345_v16 = vld [vmem:[#allocation6 + $0x7b0] sm:$0xff]  ;;  %v1326_v52 = vld [vmem:[#allocation6 + $0x718] sm:$0xff] }
 0x1e0   :  { %1512 = vmatprep.mubr.f32.mxu1 %v1098_v22  ;;  %1894 = vmatprep.subr.mxu0 %v1693_v27  ;;  %v1341_v19 = vld [vmem:[#allocation6 + $0x790] sm:$0xff]  ;;  %v1322_v27 = vld [vmem:[#allocation6 + $0x6f8] sm:$0xff] }
 0x1e1   :  { %1513 = vmatmul.mubr.f32.vlgmr.msra.gmra.mxu1 %v1097_v24  ;;  %1895 = vmatpush3.msra.mxu0 %v1677_v29  ;;  %v1337_v21 = vld [vmem:[#allocation6 + $0x770] sm:$0xff]  ;;  %v1318_v29 = vld [vmem:[#allocation6 + $0x6d8] sm:$0xff] }
 0x1e2   :  { %1591 = vmatpush1.msra.mxu1 %v1289_v25  ;;  %1654 = vmatprep.mubr.f32.mxu1 %v1098_v22  ;;  %v1334_v22 = vld [vmem:[#allocation6 + $0x758] sm:$0xff]  ;;  %v1333_v23 = vld [vmem:[#allocation6 + $0x750] sm:$0xff] }
 0x1e3   :  { %1592 = vmatprep.subr.mxu1 %v1286_v49  ;;  %1896 = vmatprep.subr.mxu0 %v1692_v31  ;;  %v1330_v25 = vld [vmem:[#allocation6 + $0x738] sm:$0xff]  ;;  %v1329_v49 = vld [vmem:[#allocation6 + $0x730] sm:$0xff] }
 0x1e4   :  { %1593 = vmatpush1.msra.mxu1 %v1285_v26  ;;  %1897 = vmatpush3.msra.mxu0 %v1676_v33  ;;  %v1325_v26 = vld [vmem:[#allocation6 + $0x710] sm:$0xff]  ;;  %v1314_v31 = vld [vmem:[#allocation6 + $0x6b8] sm:$0xff] }
 0x1e5   :  { %1594 = vmatprep.subr.mxu1 %v1282_v28  ;;  %1898 = vmatprep.subr.mxu0 %v1691_v35  ;;  %v1321_v28 = vld [vmem:[#allocation6 + $0x6f0] sm:$0xff]  ;;  %v1310_v33 = vld [vmem:[#allocation6 + $0x698] sm:$0xff] }
 0x1e6   :  { %1595 = vmatpush1.msra.mxu1 %v1281_v30  ;;  %1899 = vmatpush3.msra.mxu0 %v1675_v36  ;;  %v1317_v30 = vld [vmem:[#allocation6 + $0x6d0] sm:$0xff]  ;;  %v1306_v35 = vld [vmem:[#allocation6 + $0x678] sm:$0xff] }
 0x1e7   :  { %1596 = vmatprep.subr.mxu1 %v1278_v32  ;;  %1900 = vmatprep.subr.mxu0 %v1690_v38  ;;  %v1313_v32 = vld [vmem:[#allocation6 + $0x6b0] sm:$0xff]  ;;  %v1302_v36 = vld [vmem:[#allocation6 + $0x658] sm:$0xff] }
 0x1e8   :  { %1597 = vmatpush1.msra.mxu1 %v1277_v17  ;;  %1901 = vmatpush3.msra.mxu0 %v1674_v40  ;;  %v1309_v17 = vld [vmem:[#allocation6 + $0x690] sm:$0xff]  ;;  %v1298_v38 = vld [vmem:[#allocation6 + $0x638] sm:$0xff] }
 0x1e9   :  { %1598 = vmatprep.subr.mxu1 %v1274_v12  ;;  %1902 = vmatprep.subr.mxu0 %v1689_v42  ;;  %v1305_v12 = vld [vmem:[#allocation6 + $0x670] sm:$0xff]  ;;  %v1294_v42 = vld [vmem:[#allocation6 + $0x618] sm:$0xff] }
 0x1ea   :  { %1599 = vmatpush1.msra.mxu1 %v1273_v37  ;;  %1903 = vmatpush3.msra.mxu0 %v1673_v44  ;;  %v1301_v37 = vld [vmem:[#allocation6 + $0x650] sm:$0xff]  ;;  %v1685_v44 = vld [vmem:[#allocation9 + $0xa0] sm:$0xff] }
 0x1eb   :  { %1600 = vmatprep.subr.mxu1 %v1270_v39  ;;  %1904 = vmatprep.subr.mxu0 %v1688_v47  ;;  %v1671_v39 = vld [vmem:[#allocation9 + $0x30] sm:$0xff]  ;;  %v1686_v40 = vld [vmem:[#allocation9 + $0xa8] sm:$0xff] }
 0x1ec   :  { %1601 = vmatpush1.msra.mxu1 %v1269_v41  ;;  %1905 = vmatpush3.msra.mxu0 %v1672_v51  ;;  %v1297_v41 = vld [vmem:[#allocation6 + $0x630] sm:$0xff]  ;;  %v1668_v51 = vld [vmem:[#allocation9 + $0x18] sm:$0xff] }
 0x1ed   :  { %1602 = vmatprep.subr.mxu1 %v1266_v43  ;;  %1906 = vmatprep.subr.mxu0 %v1687_v54  ;;  %v1670_v43 = vld [vmem:[#allocation9 + $0x28] sm:$0xff]  ;;  %v1667_v54 = vld [vmem:[#allocation9 + $0x10] sm:$0xff] }
 0x1ee   :  { %1603 = vmatpush1.msra.mxu1 %v1265_v45  ;;  %1907 = vmatpush3.msra.mxu0 %v1671_v39  ;;  %v1669_v45 = vld [vmem:[#allocation9 + $0x20] sm:$0xff]  ;;  %v1293_v47 = vld [vmem:[#allocation6 + $0x610] sm:$0xff] }
 0x1ef   :  { %1604 = vmatprep.subr.mxu1 %v1262_v48  ;;  %1908 = vmatprep.subr.mxu0 %v1686_v40  ;;  %v1684_v48 = vld [vmem:[#allocation9 + $0x98] sm:$0xff]  ;;  %v1727_v14 = vld [vmem:[#allocation9 + $0x1f0] sm:$0xff] }
 0x1f0   :  { %1605 = vmatpush1.msra.mxu1 %v1261_v53  ;;  %1909 = vmatpush3.msra.mxu0 %v1670_v43  ;;  %v1683_v53 = vld [vmem:[#allocation9 + $0x90] sm:$0xff] }
 0x1f1   :  { %1606 = vmatprep.subr.mxu1 %v1258_v55  ;;  %1910 = vmatprep.subr.mxu0 %v1685_v44  ;;  %v1682_v55 = vld [vmem:[#allocation9 + $0x88] sm:$0xff] }
 0x1f2   :  { %1607 = vmatpush1.msra.mxu1 %v1257_v56  ;;  %1911 = vmatpush3.msra.mxu0 %v1669_v45  ;;  %v1666_v56 = vld [vmem:[#allocation9 + $0x8] sm:$0xff] }
 0x1f3   :  { %1608 = vmatprep.subr.mxu1 %v1254_v57  ;;  %1912 = vmatprep.subr.mxu0 %v1684_v48  ;;  %v1681_v57 = vld [vmem:[#allocation9 + $0x80] sm:$0xff] }
 0x1f4   :  { %1609 = vmatpush1.msra.mxu1 %v1253_v58  ;;  %1913 = vmatpush3.msra.mxu0 %v1668_v51  ;;  %v1665_v58 = vld [vmem:[#allocation9] sm:$0xff] }
 0x1f5   :  { %1610 = vmatprep.subr.mxu1 %v1250_v59  ;;  %1914 = vmatprep.subr.mxu0 %v1683_v53  ;;  %v1728_v59 = vld [vmem:[#allocation9 + $0x1f8] sm:$0xff] }
 0x1f6   :  { %1611 = vmatpush1.msra.mxu1 %v1249_v60  ;;  %1915 = vmatpush3.msra.mxu0 %v1667_v54  ;;  %v1712_v60 = vld [vmem:[#allocation9 + $0x178] sm:$0xff] }
 0x1f7   :  { %1612 = vmatprep.subr.mxu1 %v1246_v61  ;;  %1916 = vmatprep.subr.mxu0 %v1682_v55  ;;  %v1726_v61 = vld [vmem:[#allocation9 + $0x1e8] sm:$0xff] }
 0x1f8   :  { %1613 = vmatpush1.msra.mxu1 %v1245_v62  ;;  %1917 = vmatpush3.msra.mxu0 %v1666_v56  ;;  %v1710_v62 = vld [vmem:[#allocation9 + $0x168] sm:$0xff] }
 0x1f9   :  { %1614 = vmatprep.subr.mxu1 %v1242_v0  ;;  %1918 = vmatprep.subr.mxu0 %v1681_v57  ;;  %v1725_v0 = vld [vmem:[#allocation9 + $0x1e0] sm:$0xff] }
 0x1fa   :  { %1615 = vmatpush1.msra.mxu1 %v1241_v1  ;;  %1919 = vmatpush3.msra.mxu0 %v1665_v58  ;;  %v1709_v1 = vld [vmem:[#allocation9 + $0x160] sm:$0xff] }
 0x1fb   :  { %1616 = vmatprep.subr.mxu1 %v1238_v3  ;;  %v1724_v3 = vld [vmem:[#allocation9 + $0x1d8] sm:$0xff]  ;;  %v1887_v58 = vld [vmem:[#allocation10] ss:$0 sm:$0xff] }
 0x1fc   :  { %1617 = vmatpush1.msra.mxu1 %v1237_v4  ;;  %v1708_v4 = vld [vmem:[#allocation9 + $0x158] sm:$0xff] }
 0x1fd   :  { %1618 = vmatprep.subr.mxu1 %v1234_v5  ;;  %v1723_v5 = vld [vmem:[#allocation9 + $0x1d0] sm:$0xff] }
 0x1fe   :  { %1619 = vmatpush1.msra.mxu1 %v1233_v6  ;;  %v1707_v6 = vld [vmem:[#allocation9 + $0x150] sm:$0xff] }
 0x1ff   :  { %1620 = vmatprep.subr.mxu1 %v1230_v7  ;;  %v1722_v7 = vld [vmem:[#allocation9 + $0x1c8] sm:$0xff] }
 0x200   :  { %1621 = vmatpush1.msra.mxu1 %v1229_v8  ;;  %v1706_v8 = vld [vmem:[#allocation9 + $0x148] sm:$0xff] }
 0x201   :  { %1622 = vmatprep.subr.mxu1 %v1354_v9  ;;  %v1721_v9 = vld [vmem:[#allocation9 + $0x1c0] sm:$0xff] }
 0x202   :  { %1623 = vmatpush2.msra.mxu1 %v1353_v11  ;;  %v1705_v11 = vld [vmem:[#allocation9 + $0x140] sm:$0xff] }
 0x203   :  { %1624 = vmatprep.subr.mxu1 %v1350_v10  ;;  %v1720_v10 = vld [vmem:[#allocation9 + $0x1b8] sm:$0xff] }
 0x204   :  { %1625 = vmatpush2.msra.mxu1 %v1349_v13  ;;  %v1704_v13 = vld [vmem:[#allocation9 + $0x138] sm:$0xff] }
 0x205   :  { %1626 = vmatprep.subr.mxu1 %v1346_v15  ;;  %v1719_v15 = vld [vmem:[#allocation9 + $0x1b0] sm:$0xff] }
 0x206   :  { %1627 = vmatpush2.msra.mxu1 %v1345_v16  ;;  %v1703_v16 = vld [vmem:[#allocation9 + $0x130] sm:$0xff] }
 0x207   :  { %1628 = vmatprep.subr.mxu1 %v1342_v18  ;;  %v1718_v18 = vld [vmem:[#allocation9 + $0x1a8] sm:$0xff] }
 0x208   :  { %1629 = vmatpush2.msra.mxu1 %v1341_v19  ;;  %v1702_v19 = vld [vmem:[#allocation9 + $0x128] sm:$0xff] }
 0x209   :  { %1630 = vmatprep.subr.mxu1 %v1338_v20  ;;  %v1717_v20 = vld [vmem:[#allocation9 + $0x1a0] sm:$0xff] }
 0x20a   :  { %1631 = vmatpush2.msra.mxu1 %v1337_v21  ;;  %v1701_v21 = vld [vmem:[#allocation9 + $0x120] sm:$0xff] }
 0x20b   :  { %1632 = vmatprep.subr.mxu1 %v1334_v22  ;;  %v1716_v22 = vld [vmem:[#allocation9 + $0x198] sm:$0xff] }
 0x20c   :  { %1633 = vmatpush2.msra.mxu1 %v1333_v23  ;;  %v1700_v23 = vld [vmem:[#allocation9 + $0x118] sm:$0xff] }
 0x20d   :  { %1634 = vmatprep.subr.mxu1 %v1330_v25  ;;  %v1715_v25 = vld [vmem:[#allocation9 + $0x190] sm:$0xff] }
 0x20e   :  { %1635 = vmatpush2.msra.mxu1 %v1329_v49  ;;  %v1699_v49 = vld [vmem:[#allocation9 + $0x110] sm:$0xff] }
 0x20f   :  { %1636 = vmatprep.subr.mxu1 %v1326_v52  ;;  %v1714_v52 = vld [vmem:[#allocation9 + $0x188] sm:$0xff] }
 0x210   :  { %1637 = vmatpush2.msra.mxu1 %v1325_v26  ;;  %v1698_v26 = vld [vmem:[#allocation9 + $0x108] sm:$0xff] }
 0x211   :  { %1638 = vmatprep.subr.mxu1 %v1322_v27  ;;  %v1713_v27 = vld [vmem:[#allocation9 + $0x180] sm:$0xff] }
 0x212   :  { %1639 = vmatpush2.msra.mxu1 %v1321_v28  ;;  %v1697_v28 = vld [vmem:[#allocation9 + $0x100] sm:$0xff] }
 0x213   :  { %1640 = vmatprep.subr.mxu1 %v1318_v29  ;;  %v1355_v29 = vld [vmem:[#allocation7] sm:$0xf] }
 0x214   :  { %1641 = vmatpush2.msra.mxu1 %v1317_v30 }
 0x215   :  { %1642 = vmatprep.subr.mxu1 %v1314_v31  ;;  %v1360_v31 = vrot.slane %v1355_v29, %v505_v34  ;;  %v1372_v34 = vrot.slane %v1355_v29, %v517_v50 }
 0x216   :  { %1643 = vmatpush2.msra.mxu1 %v1313_v32  ;;  %v1364_v32 = vrot.slane %v1355_v29, %v509_v2 }
 0x217   :  { %1644 = vmatprep.subr.mxu1 %v1310_v33 }
 0x218   :  { %1645 = vmatpush2.msra.mxu1 %v1309_v17 }
 0x219   :  { %1646 = vmatprep.subr.mxu1 %v1306_v35 }
 0x21a   :  { %1647 = vmatpush2.msra.mxu1 %v1305_v12 }
 0x21b   :  { %1648 = vmatprep.subr.mxu1 %v1302_v36 }
 0x21c   :  { %1649 = vmatpush2.msra.mxu1 %v1301_v37 }
 0x21d   :  { %1650 = vmatprep.subr.mxu1 %v1298_v38 }
 0x21e   :  { %1651 = vmatpush2.msra.mxu1 %v1297_v41 }
 0x21f   :  { %1652 = vmatprep.subr.mxu1 %v1294_v42  ;;  %v1368_v42 = vrot.slane %v1355_v29, %v513_v46 }
 0x220   :  { %1653 = vmatpush2.msra.mxu1 %v1293_v47 }
 0x221   :  { %1655 = vmatmul.mubr.f32.vlgmr.msra.gmra.mxu1 %v1097_v24  ;;  %1923 = vmatprep.subr.mxu1 %v1728_v59  ;;  %v1711_v24 = vld [vmem:[#allocation9 + $0x170] sm:$0xff] }
 0x222   :  { %1924 = vmatpush3.msra.mxu1 %v1712_v60 }
 0x223   :  { %1925 = vmatprep.subr.mxu1 %v1727_v14 }
 0x224   :  { %1926 = vmatpush3.msra.mxu1 %v1711_v24 }
 0x225   :  { %1927 = vmatprep.subr.mxu1 %v1726_v61 }
 0x226   :  { %1928 = vmatpush3.msra.mxu1 %v1710_v62 }
 0x227   :  { %1929 = vmatprep.subr.mxu1 %v1725_v0 }
 0x228   :  { %1930 = vmatpush3.msra.mxu1 %v1709_v1 }
 0x229   :  { %1931 = vmatprep.subr.mxu1 %v1724_v3 }
 0x22a   :  { %1932 = vmatpush3.msra.mxu1 %v1708_v4 }
 0x22b   :  { %1933 = vmatprep.subr.mxu1 %v1723_v5 }
 0x22c   :  { %1934 = vmatpush3.msra.mxu1 %v1707_v6 }
 0x22d   :  { %1935 = vmatprep.subr.mxu1 %v1722_v7 }
 0x22e   :  { %1936 = vmatpush3.msra.mxu1 %v1706_v8 }
 0x22f   :  { %1937 = vmatprep.subr.mxu1 %v1721_v9 }
 0x230   :  { %1938 = vmatpush3.msra.mxu1 %v1705_v11 }
 0x231   :  { %1939 = vmatprep.subr.mxu1 %v1720_v10 }
 0x232   :  { %1940 = vmatpush3.msra.mxu1 %v1704_v13 }
 0x233   :  { %1941 = vmatprep.subr.mxu1 %v1719_v15 }
 0x234   :  { %1942 = vmatpush3.msra.mxu1 %v1703_v16 }
 0x235   :  { %1943 = vmatprep.subr.mxu1 %v1718_v18 }
 0x236   :  { %1944 = vmatpush3.msra.mxu1 %v1702_v19 }
 0x237   :  { %1945 = vmatprep.subr.mxu1 %v1717_v20 }
 0x238   :  { %1946 = vmatpush3.msra.mxu1 %v1701_v21 }
 0x239   :  { %1947 = vmatprep.subr.mxu1 %v1716_v22 }
 0x23a   :  { %1948 = vmatpush3.msra.mxu1 %v1700_v23 }
 0x23b   :  { %1949 = vmatprep.subr.mxu1 %v1715_v25 }
 0x23c   :  { %1950 = vmatpush3.msra.mxu1 %v1699_v49 }
 0x23d   :  { %1951 = vmatprep.subr.mxu1 %v1714_v52 }
 0x23e   :  { %1952 = vmatpush3.msra.mxu1 %v1698_v26 }
 0x23f   :  { %1953 = vmatprep.subr.mxu1 %v1713_v27 }
 0x240   :  { %1954 = vmatpush3.msra.mxu1 %v1697_v28 }
 0x25a   :  { %v1443_v30 = vpop.f32.mrf.mxu0 }
 0x25b   :  { %v1444_v17 = vadd.f32 %v1443_v30, %v1360_v31 }
 0x25c   :  { %v1445_v33 = vpop.f32.mrf.mxu0 }
 0x25d   :  { %v1446_v12 = vadd.f32 %v1445_v33, %v1364_v32 }
 0x29a   :  { %v1585_v41 = vpop.f32.mrf.mxu0 }
 0x29b   :  { %v1586_v2 = vadd.f32 %v1585_v41, %v1368_v42 }
 0x29c   :  { %v1587_v43 = vpop.f32.mrf.mxu0 }
 0x29d   :  { %v1588_v45 = vadd.f32 %v1587_v43, %v1372_v34 }
 0x2a1   :  { %v1514_v35 = vpop.f32.mrf.mxu1 }
 0x2a2   :  { %v1515_v36 = vadd.f32 %v1514_v35, %v1444_v17 }
 0x2a3   :  { %v1516_v37 = vpop.f32.mrf.mxu1 }
 0x2a4   :  { %v1517_v38 = vadd.f32 %v1516_v37, %v1446_v12  ;;  %v1661_v40 = vmax.f32 %v1515_v36, 0.0 }
 0x2a6   :  { %v1662_v39 = vmax.f32 %v1517_v38, 0.0 }
 0x2a8   :  { %1800 = vmatprep.mubr.f32.mxu0 %v1662_v39 }
 0x2a9   :  { %1801 = vmatmul.mubr.f32.vlgmr.msra.gmra.mxu0 %v1661_v40 }
 0x2e1   :  { %v1656_v44 = vpop.f32.mrf.mxu1 }
 0x2e2   :  { %v1657_v47 = vadd.f32 %v1656_v44, %v1586_v2 }
 0x2e3   :  { %v1658_v48 = vpop.f32.mrf.mxu1 }
 0x2e4   :  { %v1659_v51 = vadd.f32 %v1658_v48, %v1588_v45  ;;  %v1663_v54 = vmax.f32 %v1657_v47, 0.0 }
 0x2e6   :  { %v1664_v53 = vmax.f32 %v1659_v51, 0.0 }
 0x2e8   :  { %1870 = vmatprep.mubr.f32.mxu1 %v1664_v53 }
 0x2e9   :  { %1871 = vmatmul.mubr.f32.vlgmr.msra.gmra.mxu1 %v1663_v54 }
 0x369   :  { %v1920_v55 = vpop.f32.mrf.mxu0 }
 0x36b   :  { %v1921_v56 = vpop.f32.mrf.mxu0 }
 0x36c   :  { %v1922_v57 = vadd.f32 %v1921_v56, %v1920_v55 }
 0x36e   :  { %v1803_v60 = vadd.f32 %v1922_v57, %v1887_v58 }
 0x3a9   :  { %v1955_v59 = vpop.f32.mrf.mxu1 }
 0x3ab   :  { %v1956_v46 = vpop.f32.mrf.mxu1 }
 0x3ac   :  { %v1957_v63 = vadd.f32 %v1956_v46, %v1955_v59 }
 0x3ae   :  { %v1873_v50 = vadd.f32 %v1957_v63, %v1803_v60 }
 0x3b0   :  { %1876 = vst [vmem:[%s2271_s7] sm:$0xff] %v1873_v50 }
 0x3b1   :  { %1881 = vsyncpa [#allocation3], 1 }
 0x3b2   :  { %1882 = vsyncpa [#allocation5], 1 }
 0x3b3   :  { %1883 = vsyncpa [#allocation8], 1 }
 0x3b4   :  { %1884 = vsyncpa [#allocation11], 1 }

</bundles_post_ra>
